<compile_context>
chip_gen: v7x
topology: tpu7x:2x2x1
jax: 0.10.0
libtpu: 0.0.40
codegen_flags: <defaults>
</compile_context>

<pallas_src>
import functools

import jax
import jax.numpy as jnp
from jax.experimental import pallas as pl
from jax.experimental.pallas import tpu as pltpu


def _full_model_kernel(x_ref, w1_ref, b1_ref, w2_ref, b2_ref, w3_ref, b3_ref,
                       f_ref, bb_ref, o_ref):
    # x_ref: (3, TN)
    # w1: (64, 3)  b1: (64, 1)   w2: (64, 64) b2: (64, 1)   w3: (K, 64) b3: (K, 1)
    # F:  (S, 3)   B: (S, K)     o_ref: (S, TN)
    x = x_ref[...]

    # K=3 contraction: small MXU pass, accepted in the transposed layout.
    h1 = jnp.dot(w1_ref[...], x, preferred_element_type=jnp.float32) + b1_ref[...]
    h1 = jnp.maximum(h1, 0.0)

    h2 = jnp.dot(w2_ref[...], h1, preferred_element_type=jnp.float32) + b2_ref[...]
    h2 = jnp.maximum(h2, 0.0)

    alpha = jnp.dot(w3_ref[...], h2, preferred_element_type=jnp.float32) + b3_ref[...]

    fundamental = jnp.dot(f_ref[...], x, preferred_element_type=jnp.float32)
    black = jnp.dot(bb_ref[...], alpha, preferred_element_type=jnp.float32)

    o_ref[...] = (fundamental + black).astype(o_ref.dtype)


@functools.partial(jax.jit, static_argnames=("block_n", "out_dtype"))
def full_model_forward(rgb, params, block_n=2048, out_dtype=jnp.float32):
    """rgb: [N, 3] float32. Returns [N, S] where S = F.shape[0]."""
    w1, b1, w2, b2, w3, b3, F, B = params
    n = rgb.shape[0]
    s = F.shape[0]

    # Layout plumbing: put the big batch axis on the 128-lane axis.
    x_t = rgb.T  # [3, N]

    grid = (pl.cdiv(n, block_n),)  # ragged last block handled by Pallas
    full = lambda a: pl.BlockSpec(a.shape, lambda i: (0, 0))

    out_t = pl.pallas_call(
        _full_model_kernel,
        out_shape=jax.ShapeDtypeStruct((s, n), out_dtype),
        grid_spec=pltpu.PrefetchScalarGridSpec(
            num_scalar_prefetch=0,
            grid=grid,
            in_specs=[
                pl.BlockSpec((3, block_n), lambda i: (0, i)),  # x_t tile (lane-dense)
                full(w1), full(b1),
                full(w2), full(b2),
                full(w3), full(b3),
                full(F), full(B),
            ],
            out_specs=pl.BlockSpec((s, block_n), lambda i: (0, i)),
        ),
        compiler_params=pltpu.CompilerParams(
            dimension_semantics=("parallel",),
            vmem_limit_bytes=32 * 1024 * 1024,
        ),
    )(x_t, w1, b1, w2, b2, w3, b3, F, B)

    # Transpose back to the PyTorch [N, S] orientation. Callers that can consume
    # the lane-dense [S, N] slab directly should use out_t and skip this copy.
    return out_t.T


def init_params(key, fundamental_metamer, black_basis, input_dim=3, hidden_dim=64):
    """PyTorch-default nn.Linear init (uniform(+-1/sqrt(fan_in))); weights are
    stored [out_features, in_features] exactly like nn.Linear, so the kernel's
    W @ x matches x @ W.T + b."""
    output_dim = black_basis.shape[1]
    dims = [(input_dim, hidden_dim), (hidden_dim, hidden_dim), (hidden_dim, output_dim)]
    params = []
    for fan_in, fan_out in dims:
        key, kw, kb = jax.random.split(key, 3)
        bound = 1.0 / jnp.sqrt(jnp.float32(fan_in))
        w = jax.random.uniform(kw, (fan_out, fan_in), jnp.float32, -bound, bound)
        b = jax.random.uniform(kb, (fan_out, 1), jnp.float32, -bound, bound)
        params += [w, b]
    params += [fundamental_metamer, black_basis]
    return tuple(params)


def reference_forward(rgb, params):
    w1, b1, w2, b2, w3, b3, F, B = params
    h1 = jnp.maximum(rgb @ w1.T + b1.T, 0.0)
    h2 = jnp.maximum(h1 @ w2.T + b2.T, 0.0)
    alpha = h2 @ w3.T + b3.T
    return rgb @ F.T + alpha @ B.T


if __name__ == "__main__":
    key = jax.random.PRNGKey(0)
    kp, kf, kb, kx = jax.random.split(key, 4)

    S, K = 31, 8  # spectral bands, black-basis dimension
    F = 0.1 * jax.random.normal(kf, (S, 3), jnp.float32)   # fundamental metamer [S, 3]
    B = 0.1 * jax.random.normal(kb, (S, K), jnp.float32)   # black basis [S, K]

    params = init_params(kp, F, B)

    # N deliberately NOT a multiple of the 2048 batch tile -> exercises the
    # ragged last block (no wrapper pad/slice) and a multi-step grid.
    n = 5000
    rgb = jax.random.uniform(kx, (n, 3), jnp.float32)

    out = full_model_forward(rgb, params, block_n=2048)
    out = jax.block_until_ready(out)

    ref = reference_forward(rgb, params)
    assert out.shape == (n, S), out.shape
    max_err = float(jnp.max(jnp.abs(out - ref)))
    assert jnp.allclose(out, ref, atol=1e-4, rtol=1e-4), max_err

    # bf16 output stream (halves the dominant HBM write traffic); relaxed tol.
    out_bf16 = jax.block_until_ready(
        full_model_forward(rgb, params, block_n=2048, out_dtype=jnp.bfloat16))
    assert out_bf16.shape == (n, S), out_bf16.shape
    assert jnp.allclose(out_bf16.astype(jnp.float32), ref, atol=3e-2, rtol=3e-2)

    print("KERNEL_OK")
</pallas_src>

<mosaic_0001>
module attributes {stable_mosaic.version = 11 : i64} {
  func.func @_full_model_kernel(%arg0: i32, %arg1: memref<3x2048xf32, #tpu.memory_space<vmem>>, %arg2: memref<64x3xf32, #tpu.memory_space<vmem>>, %arg3: memref<64x1xf32, #tpu.memory_space<vmem>>, %arg4: memref<64x64xf32, #tpu.memory_space<vmem>>, %arg5: memref<64x1xf32, #tpu.memory_space<vmem>>, %arg6: memref<8x64xf32, #tpu.memory_space<vmem>>, %arg7: memref<8x1xf32, #tpu.memory_space<vmem>>, %arg8: memref<31x3xf32, #tpu.memory_space<vmem>>, %arg9: memref<31x8xf32, #tpu.memory_space<vmem>>, %arg10: memref<31x2048xf32, #tpu.memory_space<vmem>>) attributes {dimension_semantics = [#tpu.dimension_semantics<parallel>], iteration_bounds = array<i64: 3>, scalar_prefetch = 0 : i64, scratch_operands = 0 : i64, tpu.core_type = #tpu.core_type<tc>, window_params = [{transform_indices = @transform_0, window_bounds = array<i64: 3, 2048>}, {pipeline_mode = #tpu.pipeline_mode<synchronous>, transform_indices = @transform_1, window_bounds = array<i64: 64, 3>}, {pipeline_mode = #tpu.pipeline_mode<synchronous>, transform_indices = @transform_2, window_bounds = array<i64: 64, 1>}, {pipeline_mode = #tpu.pipeline_mode<synchronous>, transform_indices = @transform_3, window_bounds = array<i64: 64, 64>}, {pipeline_mode = #tpu.pipeline_mode<synchronous>, transform_indices = @transform_4, window_bounds = array<i64: 64, 1>}, {pipeline_mode = #tpu.pipeline_mode<synchronous>, transform_indices = @transform_5, window_bounds = array<i64: 8, 64>}, {pipeline_mode = #tpu.pipeline_mode<synchronous>, transform_indices = @transform_6, window_bounds = array<i64: 8, 1>}, {pipeline_mode = #tpu.pipeline_mode<synchronous>, transform_indices = @transform_7, window_bounds = array<i64: 31, 3>}, {pipeline_mode = #tpu.pipeline_mode<synchronous>, transform_indices = @transform_8, window_bounds = array<i64: 31, 8>}, {transform_indices = @transform_9, window_bounds = array<i64: 31, 2048>}]} {
    %c0 = arith.constant 0 : index
    %c0_0 = arith.constant 0 : index
    %0 = vector.load %arg1[%c0, %c0_0] : memref<3x2048xf32, #tpu.memory_space<vmem>>, vector<3x2048xf32>
    %c0_1 = arith.constant 0 : index
    %c0_2 = arith.constant 0 : index
    %1 = vector.load %arg2[%c0_1, %c0_2] : memref<64x3xf32, #tpu.memory_space<vmem>>, vector<64x3xf32>
    %cst = arith.constant dense<0.000000e+00> : vector<64x2048xf32>
    %2 = tpu.matmul %1, %0, %cst {dimension_numbers = #tpu.dot_dimension_numbers<[1], [0], [0], [1], [0, 0, 1, 1], [], []>} : vector<64x3xf32>, vector<3x2048xf32>, vector<64x2048xf32> -> vector<64x2048xf32>
    %c0_3 = arith.constant 0 : index
    %c0_4 = arith.constant 0 : index
    %3 = vector.load %arg3[%c0_3, %c0_4] : memref<64x1xf32, #tpu.memory_space<vmem>>, vector<64x1xf32>
    %4 = vector.broadcast %3 : vector<64x1xf32> to vector<64x2048xf32>
    %5 = arith.addf %2, %4 : vector<64x2048xf32>
    %cst_5 = arith.constant 0.000000e+00 : f32
    %6 = vector.broadcast %cst_5 : f32 to vector<64x2048xf32>
    %7 = arith.maximumf %5, %6 : vector<64x2048xf32>
    %c0_6 = arith.constant 0 : index
    %c0_7 = arith.constant 0 : index
    %8 = vector.load %arg4[%c0_6, %c0_7] : memref<64x64xf32, #tpu.memory_space<vmem>>, vector<64x64xf32>
    %cst_8 = arith.constant dense<0.000000e+00> : vector<64x2048xf32>
    %9 = tpu.matmul %8, %7, %cst_8 {dimension_numbers = #tpu.dot_dimension_numbers<[1], [0], [0], [1], [0, 0, 1, 1], [], []>} : vector<64x64xf32>, vector<64x2048xf32>, vector<64x2048xf32> -> vector<64x2048xf32>
    %c0_9 = arith.constant 0 : index
    %c0_10 = arith.constant 0 : index
    %10 = vector.load %arg5[%c0_9, %c0_10] : memref<64x1xf32, #tpu.memory_space<vmem>>, vector<64x1xf32>
    %11 = vector.broadcast %10 : vector<64x1xf32> to vector<64x2048xf32>
    %12 = arith.addf %9, %11 : vector<64x2048xf32>
    %cst_11 = arith.constant 0.000000e+00 : f32
    %13 = vector.broadcast %cst_11 : f32 to vector<64x2048xf32>
    %14 = arith.maximumf %12, %13 : vector<64x2048xf32>
    %c0_12 = arith.constant 0 : index
    %c0_13 = arith.constant 0 : index
    %15 = vector.load %arg6[%c0_12, %c0_13] : memref<8x64xf32, #tpu.memory_space<vmem>>, vector<8x64xf32>
    %cst_14 = arith.constant dense<0.000000e+00> : vector<8x2048xf32>
    %16 = tpu.matmul %15, %14, %cst_14 {dimension_numbers = #tpu.dot_dimension_numbers<[1], [0], [0], [1], [0, 0, 1, 1], [], []>} : vector<8x64xf32>, vector<64x2048xf32>, vector<8x2048xf32> -> vector<8x2048xf32>
    %c0_15 = arith.constant 0 : index
    %c0_16 = arith.constant 0 : index
    %17 = vector.load %arg7[%c0_15, %c0_16] : memref<8x1xf32, #tpu.memory_space<vmem>>, vector<8x1xf32>
    %18 = vector.broadcast %17 : vector<8x1xf32> to vector<8x2048xf32>
    %19 = arith.addf %16, %18 : vector<8x2048xf32>
    %c0_17 = arith.constant 0 : index
    %c0_18 = arith.constant 0 : index
    %20 = vector.load %arg8[%c0_17, %c0_18] : memref<31x3xf32, #tpu.memory_space<vmem>>, vector<31x3xf32>
    %cst_19 = arith.constant dense<0.000000e+00> : vector<31x2048xf32>
    %21 = tpu.matmul %20, %0, %cst_19 {dimension_numbers = #tpu.dot_dimension_numbers<[1], [0], [0], [1], [0, 0, 1, 1], [], []>} : vector<31x3xf32>, vector<3x2048xf32>, vector<31x2048xf32> -> vector<31x2048xf32>
    %c0_20 = arith.constant 0 : index
    %c0_21 = arith.constant 0 : index
    %22 = vector.load %arg9[%c0_20, %c0_21] : memref<31x8xf32, #tpu.memory_space<vmem>>, vector<31x8xf32>
    %cst_22 = arith.constant dense<0.000000e+00> : vector<31x2048xf32>
    %23 = tpu.matmul %22, %19, %cst_22 {dimension_numbers = #tpu.dot_dimension_numbers<[1], [0], [0], [1], [0, 0, 1, 1], [], []>} : vector<31x8xf32>, vector<8x2048xf32>, vector<31x2048xf32> -> vector<31x2048xf32>
    %24 = arith.addf %21, %23 : vector<31x2048xf32>
    %c0_23 = arith.constant 0 : index
    %c0_24 = arith.constant 0 : index
    %25 = vector.load %arg10[%c0_23, %c0_24] : memref<31x2048xf32, #tpu.memory_space<vmem>>, vector<31x2048xf32>
    tpu.vector_store %arg10[%c0_23, %c0_24], %24 {strides = array<i32>} : memref<31x2048xf32, #tpu.memory_space<vmem>>, vector<31x2048xf32>,
    return
  }
  func.func @transform_0(%arg0: i32) -> (i32, i32) {
    %c0_i32 = arith.constant 0 : i32
    %c0_i32_0 = arith.constant 0 : i32
    return %c0_i32, %arg0 : i32, i32
  }
  func.func @transform_1(%arg0: i32) -> (i32, i32) {
    %c0_i32 = arith.constant 0 : i32
    %c0_i32_0 = arith.constant 0 : i32
    %c0_i32_1 = arith.constant 0 : i32
    return %c0_i32, %c0_i32_0 : i32, i32
  }
  func.func @transform_2(%arg0: i32) -> (i32, i32) {
    %c0_i32 = arith.constant 0 : i32
    %c0_i32_0 = arith.constant 0 : i32
    %c0_i32_1 = arith.constant 0 : i32
    return %c0_i32, %c0_i32_0 : i32, i32
  }
  func.func @transform_3(%arg0: i32) -> (i32, i32) {
    %c0_i32 = arith.constant 0 : i32
    %c0_i32_0 = arith.constant 0 : i32
    %c0_i32_1 = arith.constant 0 : i32
    return %c0_i32, %c0_i32_0 : i32, i32
  }
  func.func @transform_4(%arg0: i32) -> (i32, i32) {
    %c0_i32 = arith.constant 0 : i32
    %c0_i32_0 = arith.constant 0 : i32
    %c0_i32_1 = arith.constant 0 : i32
    return %c0_i32, %c0_i32_0 : i32, i32
  }
  func.func @transform_5(%arg0: i32) -> (i32, i32) {
    %c0_i32 = arith.constant 0 : i32
    %c0_i32_0 = arith.constant 0 : i32
    %c0_i32_1 = arith.constant 0 : i32
    return %c0_i32, %c0_i32_0 : i32, i32
  }
  func.func @transform_6(%arg0: i32) -> (i32, i32) {
    %c0_i32 = arith.constant 0 : i32
    %c0_i32_0 = arith.constant 0 : i32
    %c0_i32_1 = arith.constant 0 : i32
    return %c0_i32, %c0_i32_0 : i32, i32
  }
  func.func @transform_7(%arg0: i32) -> (i32, i32) {
    %c0_i32 = arith.constant 0 : i32
    %c0_i32_0 = arith.constant 0 : i32
    %c0_i32_1 = arith.constant 0 : i32
    return %c0_i32, %c0_i32_0 : i32, i32
  }
  func.func @transform_8(%arg0: i32) -> (i32, i32) {
    %c0_i32 = arith.constant 0 : i32
    %c0_i32_0 = arith.constant 0 : i32
    %c0_i32_1 = arith.constant 0 : i32
    return %c0_i32, %c0_i32_0 : i32, i32
  }
  func.func @transform_9(%arg0: i32) -> (i32, i32) {
    %c0_i32 = arith.constant 0 : i32
    %c0_i32_0 = arith.constant 0 : i32
    return %c0_i32, %arg0 : i32, i32
  }
}

</mosaic_0001>

<bundles_post_ra>
// kernel: full_model_forward.1
= control target key start
LH: loop header
LB: loop body
LE: loop exit
PB: predicated region body
PF: predicated region fallthrough
CT: control target
= control target key end

     0   :  { %14 = vsyncpa [#allocation3], 0  ;;  %s6922_s0 = inlined_call_operand.vmem [shape: f32[3,5000], index: 0, kind: input, shape index: {}]   ;;  %s6923_s1 = inlined_call_operand.vmem [shape: f32[64,3], index: 1, kind: input, shape index: {}]   ;;  %s6924_s2 = inlined_call_operand.vmem [shape: f32[64,1], index: 2, kind: input, shape index: {}]   ;;  %s6925_s3 = inlined_call_operand.vmem [shape: f32[64,64], index: 3, kind: input, shape index: {}]   ;;  %s6926_s4 = inlined_call_operand.vmem [shape: f32[64,1], index: 4, kind: input, shape index: {}]   ;;  %s6927_s5 = inlined_call_operand.vmem [shape: f32[8,64], index: 5, kind: input, shape index: {}]   ;;  %s6928_s6 = inlined_call_operand.vmem [shape: f32[8,1], index: 6, kind: input, shape index: {}]   ;;  %s6929_s7 = inlined_call_operand.vmem [shape: f32[31,3], index: 7, kind: input, shape index: {}]   ;;  %s6930_s8 = inlined_call_operand.vmem [shape: f32[31,8], index: 8, kind: input, shape index: {}]   ;;  %s6931_s9 = inlined_call_operand.hbm [shape: f32[31,5000], index: 9, kind: output, shape index: {}]  }
   0x1   :  { %16 = vsyncpa [#allocation3 + $0x1], 0  ;;  %s5574_s30 = smov 0   ;;  %s5576_s10 = smov 0  }
   0x2   :  { %s5578_s11 = smov 0   ;;  %s5580_s12 = smov 0  }
   0x3 LB: > { %s5595_s13 = sadd.s32 4294967295, %s5517_s12   ;;  %s4823_s14 = sadd.s32 4294967294, %s5517_s12   ;;  %s5517_s12 = sphi %s5580_s12, %s6937_s12   ;;  %s5513_s11 = sphi %s5578_s11, %s6936_s11   ;;  %s5509_s10 = sphi %s5576_s10, %s6935_s10   ;;  %s5505_s30 = sphi %s5574_s30, %s6934_s30  }
   0x4   : > { %s5599_s15 = sadd.s32 1, %s5517_s12   ;;  %s223_s16 = sadd.s32 1, %s5513_s11 }
   0x5   : > { %s220_s17 = ssub.s32 %s5517_s12, %s5599_s15  ;;  %p233_p0 = scmp.ne.s32.totalorder %s5513_s11, %s5509_s10 }
   0x6   : > { %p221_p1 = scmp.eq.s32.totalorder %s220_s17, 0  ;;  %p234_p2 = scmp.eq.s32.totalorder %s5595_s13, 2 }
   0x7   : > { %p239_p3 = scmp.ne.s32.totalorder %s5509_s10, %s5505_s30  ;;  %p240_p4 = scmp.eq.s32.totalorder %s4823_s14, 2 }
   0x8   : > { %s5610_s18 = scalar_select %p221_p1, %s5513_s11, %s223_s16  }
   0x9   : > { %p5612_p5 = por %p234_p2, %p233_p0  ;;  %p5616_p6 = por %p240_p4, %p239_p3 }
   0xa   : > { %p4826_p7 = scmp.ge.s32.totalorder %s5517_s12, 1  ;;  %p299_p8 = scmp.lt.s32.totalorder %s5517_s12, 4 }
   0xc   : > { %p300_p9 = pnand %p4826_p7, %p299_p8 }
   0xd   : > { %s5623_s21 = sshll.u32 (!%p300_p9), %s5595_s13, 4  ;;  %v5519_v0 = vmov (!%p300_p9), 0.0   ;;  %v5520_v1 = vmov (!%p300_p9), 0   ;;  %v374_v2 = vld [vmem:[%s6924_s2] sm:$0xff] (!%p300_p9)  ;;  %v376_v3 = vld [vmem:[%s6924_s2 + $0x10] sm:$0xff] (!%p300_p9)  ;;  %v375_v4 = vld [vmem:[%s6924_s2 + $0x8] sm:$0xff] (!%p300_p9) }
   0xe   : > { %303 = sbr.rel (%p300_p9) target bundleno = 1166 (0x48e), region = 56  ;;  %p344_p10 = scmp.lt.s32.totalorder (!%p300_p9), %s5623_s21, 39  ;;  %560 = vmatprep.mubr.f32.mxu0 (!%p300_p9), %v5519_v0  ;;  %673 = vmatprep.mubr.f32.mxu1 (!%p300_p9), %v5519_v0  ;;  %vm463_vm0 = vcmask (!%p300_p9), 1042432   ;;  %v377_v5 = vld [vmem:[%s6924_s2 + $0x18] sm:$0xff] (!%p300_p9)  ;;  %v5657_v12 = vld [vmem:[%s6923_s1] sm:$0xff] (!%p300_p9)  ;;  %vm438_vm1 = vcmask (!%p300_p9), 23552  }
   0xf   : > { %5437 = vset.pattern.permute.xlu0 (!%p300_p9), %v5520_v1  ;;  %5438 = vset.pattern.permute.xlu1 (!%p300_p9), %v5520_v1  ;;  %v5684_v17 = vld [vmem:[%s6923_s1 + $0x8] sm:$0xff] (!%p300_p9)  ;;  %v378_v20 = vld [vmem:[%s6924_s2 + $0x20] sm:$0xff] (!%p300_p9)  ;;  %v5715_v22 = vld [vmem:[%s6923_s1 + $0x10] sm:$0xff] (!%p300_p9)  ;;  %vm1584_vm2 = vcmask (!%p300_p9), 523264   ;;  %vm3227_vm3 = vcmask (!%p300_p9), 64512  }
  0x10   : > { %384 = vperm.xlu0 (!%p300_p9), %5437, %v374_v2   ;;  %394 = vperm.xlu1 (!%p300_p9), %5438, %v376_v3   ;;  %v379_v21 = vld [vmem:[%s6924_s2 + $0x28] sm:$0xff] (!%p300_p9)  ;;  %v380_v23 = vld [vmem:[%s6924_s2 + $0x30] sm:$0xff] (!%p300_p9)  ;;  %v381_v24 = vld [vmem:[%s6924_s2 + $0x38] sm:$0xff] (!%p300_p9) }
  0x11   : > { %v5736_v25 = vld [vmem:[%s6923_s1 + $0x18] sm:$0xff] (!%p300_p9)  ;;  %v1536_v26 = vld [vmem:[%s6926_s4] sm:$0xff] (!%p300_p9)  ;;  %v1537_v27 = vld [vmem:[%s6926_s4 + $0x8] sm:$0xff] (!%p300_p9) }
  0x12   : > { %v5753_v28 = vld [vmem:[%s6923_s1 + $0x20] sm:$0xff] (!%p300_p9)  ;;  %v1538_v29 = vld [vmem:[%s6926_s4 + $0x10] sm:$0xff] (!%p300_p9)  ;;  %v1539_v30 = vld [vmem:[%s6926_s4 + $0x18] sm:$0xff] (!%p300_p9) }
  0x13   : > { %v5770_v31 = vld [vmem:[%s6923_s1 + $0x28] sm:$0xff] (!%p300_p9)  ;;  %v1540_v32 = vld [vmem:[%s6926_s4 + $0x20] sm:$0xff] (!%p300_p9)  ;;  %v5787_v34 = vld [vmem:[%s6923_s1 + $0x30] sm:$0xff] (!%p300_p9) }
  0x14   : > { %389 = vperm.xlu0 (!%p300_p9), %5437, %v375_v4   ;;  %399 = vperm.xlu1 (!%p300_p9), %5438, %v377_v5   ;;  %v1541_v33 = vld [vmem:[%s6926_s4 + $0x28] sm:$0xff] (!%p300_p9)  ;;  %v1542_v35 = vld [vmem:[%s6926_s4 + $0x30] sm:$0xff] (!%p300_p9)  ;;  %v1543_v36 = vld [vmem:[%s6926_s4 + $0x38] sm:$0xff] (!%p300_p9) }
  0x15   : > { %s345_s22 = scalar_select %p344_p10, %s5623_s21, 39  ;;  %v5804_v37 = vld [vmem:[%s6923_s1 + $0x38] sm:$0xff]  ;;  %v2642_v40 = vld [vmem:[%s6928_s6] sm:$0xff] }
  0x16   : > { %s4749_s24 = ssub.s32 (%p5612_p5), 40, %s5623_s21 }
  0x17   : > { %s4829_s27 = sshll.u32 %s345_s22, 2  ;;  %p4750_p11 = scmp.lt.s32.totalorder (%p5612_p5), %s4749_s24, 16 }
  0x18   : > { %s5641_s17 = scalar_lea.vmem %s6922_s0, %s4829_s27  ;;  %404 = vperm.xlu0 %5437, %v378_v20   ;;  %409 = vperm.xlu1 %5438, %v379_v21  }
  0x19   : > { %v358_v6 = vld [vmem:[%s5641_s17] sm:$0x77]  ;;  %v359_v7 = vld [vmem:[%s5641_s17 + $0x8] sm:$0x77]  ;;  %v360_v8 = vld [vmem:[%s5641_s17 + $0x10] sm:$0x77] }
  0x1a   : > { %v5649_v9 = vcombine.high %v358_v6, %v358_v6  ;;  %v5651_v10 = vcombine.high %v359_v7, %v359_v7  ;;  %v361_v11 = vld [vmem:[%s5641_s17 + $0x18] sm:$0x77]  ;;  %v5663_v13 = vcombine.high %v360_v8, %v360_v8  ;;  %v5670_v15 = vld [vmem:[%s5641_s17 + $0x20] sm:$0x77]  ;;  %v5673_v16 = vld [vmem:[%s5641_s17 + $0x28] sm:$0x77] }
  0x1b   : > { %v5665_v14 = vcombine.high %v361_v11, %v361_v11  ;;  %v5692_v18 = vcombine.high %v5670_v15, %v5670_v15  ;;  %v5696_v19 = vcombine.high %v5673_v16, %v5673_v16  ;;  %v364_v38 = vld [vmem:[%s5641_s17 + $0x30] sm:$0x77]  ;;  %v365_v39 = vld [vmem:[%s5641_s17 + $0x38] sm:$0x77] }
  0x1c   : > { %4830 = vmatprep.subr.msk.mxu0 %vm463_vm0, %v5649_v9  ;;  %4840 = vmatprep.subr.msk.mxu1 %vm463_vm0, %v5651_v10  ;;  %v5817_v41 = vcombine.high %v364_v38, %v364_v38  ;;  %v5819_v42 = vcombine.high %v365_v39, %v365_v39 }
  0x1d   : > { %4831 = vmatpush1.msk.msra.mxu0 %vm463_vm0, %v358_v6  ;;  %4841 = vmatpush1.msk.msra.mxu1 %vm463_vm0, %v359_v7 }
  0x1e   : > { %4832 = vmatmul.mubr.msk.f32.vlgmr.msra.gmra.mrb[0].mxu0 %vm438_vm1, %v5657_v12  ;;  %4842 = vmatmul.mubr.msk.f32.vlgmr.msra.gmra.mrb[0].mxu1 %vm438_vm1, %v5657_v12 }
  0x1f   : > { %566 = vmatprep.mubr.f32.mxu0 %v5519_v0  ;;  %679 = vmatprep.mubr.f32.mxu1 %v5519_v0 }
  0x20   : > { %4850 = vmatprep.subr.msk.mxu0 %vm463_vm0, %v5663_v13  ;;  %4860 = vmatprep.subr.msk.mxu1 %vm463_vm0, %v5665_v14 }
  0x21   : > { %4851 = vmatpush1.msk.msra.mxu0 %vm463_vm0, %v360_v8  ;;  %4861 = vmatpush1.msk.msra.mxu1 %vm463_vm0, %v361_v11 }
  0x22   : > { %4833 = vmatmul.mubr.msk.f32.gmra.mrb[2].mxu0 %vm438_vm1, %v5684_v17  ;;  %4843 = vmatmul.mubr.msk.f32.gmra.mrb[2].mxu1 %vm438_vm1, %v5684_v17 }
  0x23   : > { %572 = vmatprep.mubr.f32.mxu0 %v5519_v0  ;;  %685 = vmatprep.mubr.f32.mxu1 %v5519_v0 }
  0x24   : > { %4870 = vmatprep.subr.msk.mxu0 %vm463_vm0, %v5692_v18  ;;  %4880 = vmatprep.subr.msk.mxu1 %vm463_vm0, %v5696_v19 }
  0x25   : > { %414 = vperm.xlu0 %5437, %v380_v23   ;;  %419 = vperm.xlu1 %5438, %v381_v24  }
  0x26   : > { %4834 = vmatmul.mubr.msk.f32.gmra.mrb[4].mxu0 %vm438_vm1, %v5715_v22  ;;  %4844 = vmatmul.mubr.msk.f32.gmra.mrb[4].mxu1 %vm438_vm1, %v5715_v22 }
  0x27   : > { %578 = vmatprep.mubr.f32.mxu0 %v5519_v0  ;;  %691 = vmatprep.mubr.f32.mxu1 %v5519_v0 }
  0x29   : > { %1546 = vperm.xlu0 %5437, %v1536_v26   ;;  %1551 = vperm.xlu1 %5438, %v1537_v27  }
  0x2a   : > { %4835 = vmatmul.mubr.msk.f32.gmra.mrb[6].mxu0 %vm438_vm1, %v5736_v25  ;;  %4845 = vmatmul.mubr.msk.f32.gmra.mrb[6].mxu1 %vm438_vm1, %v5736_v25 }
  0x2b   : > { %584 = vmatprep.mubr.f32.mxu0 %v5519_v0  ;;  %697 = vmatprep.mubr.f32.mxu1 %v5519_v0 }
  0x2d   : > { %1556 = vperm.xlu0 %5437, %v1538_v29   ;;  %1561 = vperm.xlu1 %5438, %v1539_v30  }
  0x2e   : > { %4836 = vmatmul.mubr.msk.f32.gmra.mrb[8].mxu0 %vm438_vm1, %v5753_v28  ;;  %4846 = vmatmul.mubr.msk.f32.gmra.mrb[8].mxu1 %vm438_vm1, %v5753_v28 }
  0x2f   : > { %590 = vmatprep.mubr.f32.mxu0 %v5519_v0  ;;  %703 = vmatprep.mubr.f32.mxu1 %v5519_v0 }
  0x31   : > { %1566 = vperm.xlu0 %5437, %v1540_v32   ;;  %1571 = vperm.xlu1 %5438, %v1541_v33  }
  0x32   : > { %4837 = vmatmul.mubr.msk.f32.gmra.mrb[10].mxu0 %vm438_vm1, %v5770_v31  ;;  %4847 = vmatmul.mubr.msk.f32.gmra.mrb[10].mxu1 %vm438_vm1, %v5770_v31 }
  0x33   : > { %596 = vmatprep.mubr.f32.mxu0 %v5519_v0  ;;  %709 = vmatprep.mubr.f32.mxu1 %v5519_v0 }
  0x35   : > { %1576 = vperm.xlu0 %5437, %v1542_v35   ;;  %1581 = vperm.xlu1 %5438, %v1543_v36  }
  0x36   : > { %4838 = vmatmul.mubr.msk.f32.gmra.mrb[12].mxu0 %vm438_vm1, %v5787_v34  ;;  %4848 = vmatmul.mubr.msk.f32.gmra.mrb[12].mxu1 %vm438_vm1, %v5787_v34 }
  0x37   : > { %602 = vmatprep.mubr.f32.mxu0 %v5519_v0  ;;  %715 = vmatprep.mubr.f32.mxu1 %v5519_v0 }
  0x39   : > { %2645 = vperm.xlu0 %5437, %v2642_v40  }
  0x3a   : > { %4839 = vmatmul.mubr.msk.f32.gmra.mrb[14].mxu0 %vm438_vm1, %v5804_v37  ;;  %4849 = vmatmul.mubr.msk.f32.gmra.mrb[14].mxu1 %vm438_vm1, %v5804_v37 }
  0x3b   : > { %786 = vmatprep.mubr.f32.mxu0 %v5519_v0  ;;  %899 = vmatprep.mubr.f32.mxu1 %v5519_v0 }
  0x3e   : > { %4852 = vmatmul.mubr.msk.f32.vlgmr.msra.gmra.mrb[16].mxu0 %vm438_vm1, %v5657_v12  ;;  %4862 = vmatmul.mubr.msk.f32.vlgmr.msra.gmra.mrb[16].mxu1 %vm438_vm1, %v5657_v12 }
  0x3f   : > { %792 = vmatprep.mubr.f32.mxu0 %v5519_v0  ;;  %905 = vmatprep.mubr.f32.mxu1 %v5519_v0 }
  0x40   : > { %4871 = vmatpush1.msk.msra.mxu0 %vm463_vm0, %v5670_v15  ;;  %4881 = vmatpush1.msk.msra.mxu1 %vm463_vm0, %v5673_v16 }
  0x41   : > { %4890 = vmatprep.subr.msk.mxu0 %vm463_vm0, %v5817_v41  ;;  %4900 = vmatprep.subr.msk.mxu1 %vm463_vm0, %v5819_v42 }
  0x42   : > { %4853 = vmatmul.mubr.msk.f32.gmra.mrb[18].mxu0 %vm438_vm1, %v5684_v17  ;;  %4863 = vmatmul.mubr.msk.f32.gmra.mrb[18].mxu1 %vm438_vm1, %v5684_v17 }
  0x43   : > { %798 = vmatprep.mubr.f32.mxu0 %v5519_v0  ;;  %911 = vmatprep.mubr.f32.mxu1 %v5519_v0 }
  0x46   : > { %4854 = vmatmul.mubr.msk.f32.gmra.mrb[20].mxu0 %vm438_vm1, %v5715_v22  ;;  %4864 = vmatmul.mubr.msk.f32.gmra.mrb[20].mxu1 %vm438_vm1, %v5715_v22 }
  0x47   : > { %804 = vmatprep.mubr.f32.mxu0 %v5519_v0  ;;  %917 = vmatprep.mubr.f32.mxu1 %v5519_v0 }
  0x4a   : > { %4855 = vmatmul.mubr.msk.f32.gmra.mrb[22].mxu0 %vm438_vm1, %v5736_v25  ;;  %4865 = vmatmul.mubr.msk.f32.gmra.mrb[22].mxu1 %vm438_vm1, %v5736_v25 }
  0x4b   : > { %810 = vmatprep.mubr.f32.mxu0 %v5519_v0  ;;  %923 = vmatprep.mubr.f32.mxu1 %v5519_v0 }
  0x4e   : > { %4856 = vmatmul.mubr.msk.f32.gmra.mrb[24].mxu0 %vm438_vm1, %v5753_v28  ;;  %4866 = vmatmul.mubr.msk.f32.gmra.mrb[24].mxu1 %vm438_vm1, %v5753_v28 }
  0x4f   : > { %816 = vmatprep.mubr.f32.mxu0 %v5519_v0  ;;  %929 = vmatprep.mubr.f32.mxu1 %v5519_v0 }
  0x52   : > { %4857 = vmatmul.mubr.msk.f32.gmra.mrb[26].mxu0 %vm438_vm1, %v5770_v31  ;;  %4867 = vmatmul.mubr.msk.f32.gmra.mrb[26].mxu1 %vm438_vm1, %v5770_v31 }
  0x53   : > { %822 = vmatprep.mubr.f32.mxu0 %v5519_v0  ;;  %935 = vmatprep.mubr.f32.mxu1 %v5519_v0 }
  0x56   : > { %4858 = vmatmul.mubr.msk.f32.gmra.mrb[28].mxu0 %vm438_vm1, %v5787_v34  ;;  %4868 = vmatmul.mubr.msk.f32.gmra.mrb[28].mxu1 %vm438_vm1, %v5787_v34 }
  0x57   : > { %828 = vmatprep.mubr.f32.mxu0 %v5519_v0  ;;  %941 = vmatprep.mubr.f32.mxu1 %v5519_v0 }
  0x5a   : > { %4859 = vmatmul.mubr.msk.f32.gmra.mrb[30].mxu0 %vm438_vm1, %v5804_v37  ;;  %4869 = vmatmul.mubr.msk.f32.gmra.mrb[30].mxu1 %vm438_vm1, %v5804_v37 }
  0x5b   : > { %1012 = vmatprep.mubr.f32.mxu0 %v5519_v0  ;;  %1125 = vmatprep.mubr.f32.mxu1 %v5519_v0 }
  0x5e   : > { %4872 = vmatmul.mubr.msk.f32.vlgmr.msra.gmra.mrb[32].mxu0 %vm438_vm1, %v5657_v12  ;;  %4882 = vmatmul.mubr.msk.f32.vlgmr.msra.gmra.mrb[32].mxu1 %vm438_vm1, %v5657_v12 }
  0x5f   : > { %1018 = vmatprep.mubr.f32.mxu0 %v5519_v0  ;;  %1131 = vmatprep.mubr.f32.mxu1 %v5519_v0 }
  0x60   : > { %4891 = vmatpush1.msk.msra.mxu0 %vm463_vm0, %v364_v38  ;;  %4901 = vmatpush1.msk.msra.mxu1 %vm463_vm0, %v365_v39 }
  0x62   : > { %4873 = vmatmul.mubr.msk.f32.gmra.mrb[34].mxu0 %vm438_vm1, %v5684_v17  ;;  %4883 = vmatmul.mubr.msk.f32.gmra.mrb[34].mxu1 %vm438_vm1, %v5684_v17 }
  0x63   : > { %1024 = vmatprep.mubr.f32.mxu0 %v5519_v0  ;;  %1137 = vmatprep.mubr.f32.mxu1 %v5519_v0 }
  0x66   : > { %4874 = vmatmul.mubr.msk.f32.gmra.mrb[36].mxu0 %vm438_vm1, %v5715_v22  ;;  %4884 = vmatmul.mubr.msk.f32.gmra.mrb[36].mxu1 %vm438_vm1, %v5715_v22 }
  0x67   : > { %1030 = vmatprep.mubr.f32.mxu0 %v5519_v0  ;;  %1143 = vmatprep.mubr.f32.mxu1 %v5519_v0 }
  0x6a   : > { %4875 = vmatmul.mubr.msk.f32.gmra.mrb[38].mxu0 %vm438_vm1, %v5736_v25  ;;  %4885 = vmatmul.mubr.msk.f32.gmra.mrb[38].mxu1 %vm438_vm1, %v5736_v25 }
  0x6b   : > { %1036 = vmatprep.mubr.f32.mxu0 %v5519_v0  ;;  %1149 = vmatprep.mubr.f32.mxu1 %v5519_v0 }
  0x6e   : > { %4876 = vmatmul.mubr.msk.f32.gmra.mrb[40].mxu0 %vm438_vm1, %v5753_v28  ;;  %4886 = vmatmul.mubr.msk.f32.gmra.mrb[40].mxu1 %vm438_vm1, %v5753_v28 }
  0x6f   : > { %1042 = vmatprep.mubr.f32.mxu0 %v5519_v0  ;;  %1155 = vmatprep.mubr.f32.mxu1 %v5519_v0 }
  0x72   : > { %4877 = vmatmul.mubr.msk.f32.gmra.mrb[42].mxu0 %vm438_vm1, %v5770_v31  ;;  %4887 = vmatmul.mubr.msk.f32.gmra.mrb[42].mxu1 %vm438_vm1, %v5770_v31 }
  0x73   : > { %1048 = vmatprep.mubr.f32.mxu0 %v5519_v0  ;;  %1161 = vmatprep.mubr.f32.mxu1 %v5519_v0 }
  0x76   : > { %4878 = vmatmul.mubr.msk.f32.gmra.mrb[44].mxu0 %vm438_vm1, %v5787_v34  ;;  %4888 = vmatmul.mubr.msk.f32.gmra.mrb[44].mxu1 %vm438_vm1, %v5787_v34 }
  0x77   : > { %1054 = vmatprep.mubr.f32.mxu0 %v5519_v0  ;;  %1167 = vmatprep.mubr.f32.mxu1 %v5519_v0 }
  0x7a   : > { %4879 = vmatmul.mubr.msk.f32.gmra.mrb[46].mxu0 %vm438_vm1, %v5804_v37  ;;  %4889 = vmatmul.mubr.msk.f32.gmra.mrb[46].mxu1 %vm438_vm1, %v5804_v37 }
  0x7b   : > { %1238 = vmatprep.mubr.f32.mxu0 %v5519_v0  ;;  %1351 = vmatprep.mubr.f32.mxu1 %v5519_v0 }
  0x7e   : > { %4892 = vmatmul.mubr.msk.f32.vlgmr.msra.gmra.mrb[48].mxu0 %vm438_vm1, %v5657_v12  ;;  %4902 = vmatmul.mubr.msk.f32.vlgmr.msra.gmra.mrb[48].mxu1 %vm438_vm1, %v5657_v12 }
  0x7f   : > { %1244 = vmatprep.mubr.f32.mxu0 %v5519_v0  ;;  %1357 = vmatprep.mubr.f32.mxu1 %v5519_v0 }
  0x82   : > { %4893 = vmatmul.mubr.msk.f32.gmra.mrb[50].mxu0 %vm438_vm1, %v5684_v17  ;;  %4903 = vmatmul.mubr.msk.f32.gmra.mrb[50].mxu1 %vm438_vm1, %v5684_v17 }
  0x83   : > { %1250 = vmatprep.mubr.f32.mxu0 %v5519_v0  ;;  %1363 = vmatprep.mubr.f32.mxu1 %v5519_v0 }
  0x86   : > { %4894 = vmatmul.mubr.msk.f32.gmra.mrb[52].mxu0 %vm438_vm1, %v5715_v22  ;;  %4904 = vmatmul.mubr.msk.f32.gmra.mrb[52].mxu1 %vm438_vm1, %v5715_v22 }
  0x87   : > { %1256 = vmatprep.mubr.f32.mxu0 %v5519_v0  ;;  %1369 = vmatprep.mubr.f32.mxu1 %v5519_v0 }
  0x8a   : > { %4895 = vmatmul.mubr.msk.f32.gmra.mrb[54].mxu0 %vm438_vm1, %v5736_v25  ;;  %4905 = vmatmul.mubr.msk.f32.gmra.mrb[54].mxu1 %vm438_vm1, %v5736_v25 }
  0x8b   : > { %1262 = vmatprep.mubr.f32.mxu0 %v5519_v0  ;;  %1375 = vmatprep.mubr.f32.mxu1 %v5519_v0 }
  0x8e   : > { %4896 = vmatmul.mubr.msk.f32.gmra.mrb[56].mxu0 %vm438_vm1, %v5753_v28  ;;  %4906 = vmatmul.mubr.msk.f32.gmra.mrb[56].mxu1 %vm438_vm1, %v5753_v28 }
  0x8f   : > { %1268 = vmatprep.mubr.f32.mxu0 %v5519_v0  ;;  %1381 = vmatprep.mubr.f32.mxu1 %v5519_v0  ;;  %v5975_v43 = vpop.permute.xlu0 %384  ;;  %v5979_v49 = vpop.permute.xlu1 %394 }
  0x92   : > { %4897 = vmatmul.mubr.msk.f32.gmra.mrb[58].mxu0 %vm438_vm1, %v5770_v31  ;;  %4907 = vmatmul.mubr.msk.f32.gmra.mrb[58].mxu1 %vm438_vm1, %v5770_v31 }
  0x93   : > { %1274 = vmatprep.mubr.f32.mxu0 %v5519_v0  ;;  %1387 = vmatprep.mubr.f32.mxu1 %v5519_v0  ;;  %v5977_v48 = vpop.permute.xlu0 %389  ;;  %v5989_v21 = vpop.permute.xlu1 %399 }
  0x96   : > { %4898 = vmatmul.mubr.msk.f32.gmra.mrb[60].mxu0 %vm438_vm1, %v5787_v34  ;;  %4908 = vmatmul.mubr.msk.f32.gmra.mrb[60].mxu1 %vm438_vm1, %v5787_v34 }
  0x97   : > { %1280 = vmatprep.mubr.f32.mxu0 %v5519_v0  ;;  %1393 = vmatprep.mubr.f32.mxu1 %v5519_v0 }
  0x9a   : > { %4899 = vmatmul.mubr.msk.f32.gmra.mrb[62].mxu0 %vm438_vm1, %v5804_v37  ;;  %4909 = vmatmul.mubr.msk.f32.gmra.mrb[62].mxu1 %vm438_vm1, %v5804_v37 }
  0x9b   : > { %1673 = vmatprep.mubr.f32.mxu0 %v5519_v0  ;;  %1786 = vmatprep.mubr.f32.mxu1 %v5519_v0 }
  0xf1   : > { %v562_v44 = vpop.f32.mrb[0].mxu0  ;;  %v675_v45 = vpop.f32.mrb[0].mxu1 }
  0xf2   : > { %v564_v46 = vpop.f32.mrb[1].mxu0  ;;  %v677_v47 = vpop.f32.mrb[1].mxu1  ;;  %v563_v50 = vadd.f32 %v562_v44, %v5975_v43  ;;  %v676_v51 = vadd.f32 %v675_v45, %v5975_v43 }
  0xf3   : > { %v565_v52 = vadd.f32 %v564_v46, %v5975_v43  ;;  %v678_v53 = vadd.f32 %v677_v47, %v5975_v43 }
  0xf4   : > { %v1400_v62 = vmax.f32 %v563_v50, 0.0  ;;  %v1402_v63 = vmax.f32 %v676_v51, 0.0 }
  0xf5   : > { %v568_v54 = vpop.f32.mrb[2].mxu0  ;;  %v681_v55 = vpop.f32.mrb[2].mxu1  ;;  %v1401_v3 = vmax.f32 %v565_v52, 0.0  ;;  %v1403_v4 = vmax.f32 %v678_v53, 0.0 }
  0xf6   : > { %v569_v56 = vadd.f32 %v568_v54, %v5977_v48  ;;  %v682_v57 = vadd.f32 %v681_v55, %v5977_v48  ;;  %v570_v58 = vpop.f32.mrb[3].mxu0  ;;  %v683_v59 = vpop.f32.mrb[3].mxu1 }
  0xf7   : > { %v571_v60 = vadd.f32 %v570_v58, %v5977_v48  ;;  %v684_v61 = vadd.f32 %v683_v59, %v5977_v48  ;;  %v5999_v53 = vpop.permute.xlu0 %404 }
  0xf8   : > { %v1416_v1 = vmax.f32 %v569_v56, 0.0  ;;  %v1418_v2 = vmax.f32 %v682_v57, 0.0  ;;  %v6001_v56 = vpop.permute.xlu1 %409 }
  0xf9   : > { %v1417_v5 = vmax.f32 %v571_v60, 0.0  ;;  %v1419_v6 = vmax.f32 %v684_v61, 0.0  ;;  %v574_v7 = vpop.f32.mrb[4].mxu0  ;;  %v687_v8 = vpop.f32.mrb[4].mxu1 }
  0xfa   : > { %v5077_v11 = vpack.c.bf16 %v1416_v1, %v1400_v62  ;;  %v5093_v12 = vpack.c.bf16 %v1418_v2, %v1402_v63  ;;  %v576_v15 = vpop.f32.mrb[5].mxu0  ;;  %v689_v16 = vpop.f32.mrb[5].mxu1  ;;  %v575_v22 = vadd.f32 %v574_v7, %v5979_v49  ;;  %v688_v23 = vadd.f32 %v687_v8, %v5979_v49 }
  0xfb   : > { %v5075_v17 = vpack.c.bf16 %v1417_v5, %v1401_v3  ;;  %v5091_v20 = vpack.c.bf16 %v1419_v6, %v1403_v4  ;;  %v577_v24 = vadd.f32 %v576_v15, %v5979_v49  ;;  %v690_v25 = vadd.f32 %v689_v16, %v5979_v49 }
  0xfc   : > { %v1432_v34 = vmax.f32 %v575_v22, 0.0  ;;  %v1434_v35 = vmax.f32 %v688_v23, 0.0 }
  0xfd   : > { %v580_v26 = vpop.f32.mrb[6].mxu0  ;;  %v693_v27 = vpop.f32.mrb[6].mxu1  ;;  %5076 = vmatprep.subr.bf16.mxu0 %v5075_v17  ;;  %5092 = vmatprep.subr.bf16.mxu1 %v5091_v20  ;;  %v1433_v38 = vmax.f32 %v577_v24, 0.0  ;;  %v1435_v39 = vmax.f32 %v690_v25, 0.0 }
  0xfe   : > { %v581_v28 = vadd.f32 %v580_v26, %v5989_v21  ;;  %v694_v29 = vadd.f32 %v693_v27, %v5989_v21  ;;  %v582_v30 = vpop.f32.mrb[7].mxu0  ;;  %v695_v31 = vpop.f32.mrb[7].mxu1  ;;  %5078 = vmatpush1.bf16.msra.mxu0 %v5077_v11  ;;  %5094 = vmatpush1.bf16.msra.mxu1 %v5093_v12 }
  0xff   : > { %v583_v32 = vadd.f32 %v582_v30, %v5989_v21  ;;  %v696_v33 = vadd.f32 %v695_v31, %v5989_v21  ;;  %v6011_v27 = vpop.permute.xlu0 %414  ;;  %v6013_v30 = vpop.permute.xlu1 %419 }
 0x100   : > { %v1448_v36 = vmax.f32 %v581_v28, 0.0  ;;  %v1450_v37 = vmax.f32 %v694_v29, 0.0 }
 0x101   : > { %v1449_v40 = vmax.f32 %v583_v32, 0.0  ;;  %v1451_v44 = vmax.f32 %v696_v33, 0.0  ;;  %v586_v45 = vpop.f32.mrb[8].mxu0  ;;  %v699_v46 = vpop.f32.mrb[8].mxu1 }
 0x102   : > { %v5081_v47 = vpack.c.bf16 %v1448_v36, %v1432_v34  ;;  %v5097_v50 = vpack.c.bf16 %v1450_v37, %v1434_v35  ;;  %v588_v51 = vpop.f32.mrb[9].mxu0  ;;  %v701_v52 = vpop.f32.mrb[9].mxu1  ;;  %v587_v57 = vadd.f32 %v586_v45, %v5999_v53  ;;  %v700_v58 = vadd.f32 %v699_v46, %v5999_v53 }
 0x103   : > { %v5079_v54 = vpack.c.bf16 %v1449_v40, %v1433_v38  ;;  %v5095_v55 = vpack.c.bf16 %v1451_v44, %v1435_v39  ;;  %v589_v59 = vadd.f32 %v588_v51, %v5999_v53  ;;  %v702_v60 = vadd.f32 %v701_v52, %v5999_v53 }
 0x104   : > { %v1464_v6 = vmax.f32 %v587_v57, 0.0  ;;  %v1466_v7 = vmax.f32 %v700_v58, 0.0 }
 0x105   : > { %v592_v61 = vpop.f32.mrb[10].mxu0  ;;  %v705_v62 = vpop.f32.mrb[10].mxu1  ;;  %5080 = vmatprep.subr.bf16.mxu0 %v5079_v54  ;;  %5096 = vmatprep.subr.bf16.mxu1 %v5095_v55  ;;  %v1465_v12 = vmax.f32 %v589_v59, 0.0  ;;  %v1467_v15 = vmax.f32 %v702_v60, 0.0 }
 0x106   : > { %v593_v63 = vadd.f32 %v592_v61, %v6001_v56  ;;  %v706_v1 = vadd.f32 %v705_v62, %v6001_v56  ;;  %v594_v2 = vpop.f32.mrb[11].mxu0  ;;  %v707_v3 = vpop.f32.mrb[11].mxu1  ;;  %5082 = vmatpush1.bf16.msra.mxu0 %v5081_v47  ;;  %5098 = vmatpush1.bf16.msra.mxu1 %v5097_v50 }
 0x107   : > { %v595_v4 = vadd.f32 %v594_v2, %v6001_v56  ;;  %v708_v5 = vadd.f32 %v707_v3, %v6001_v56 }
 0x108   : > { %v1480_v8 = vmax.f32 %v593_v63, 0.0  ;;  %v1482_v11 = vmax.f32 %v706_v1, 0.0 }
 0x109   : > { %v1481_v16 = vmax.f32 %v595_v4, 0.0  ;;  %v1483_v17 = vmax.f32 %v708_v5, 0.0  ;;  %v598_v20 = vpop.f32.mrb[12].mxu0  ;;  %v711_v22 = vpop.f32.mrb[12].mxu1 }
 0x10a   : > { %v5085_v23 = vpack.c.bf16 %v1480_v8, %v1464_v6  ;;  %v5101_v24 = vpack.c.bf16 %v1482_v11, %v1466_v7  ;;  %v600_v25 = vpop.f32.mrb[13].mxu0  ;;  %v713_v26 = vpop.f32.mrb[13].mxu1  ;;  %v599_v31 = vadd.f32 %v598_v20, %v6011_v27  ;;  %v712_v32 = vadd.f32 %v711_v22, %v6011_v27 }
 0x10b   : > { %v5083_v28 = vpack.c.bf16 %v1481_v16, %v1465_v12  ;;  %v5099_v29 = vpack.c.bf16 %v1483_v17, %v1467_v15  ;;  %v601_v33 = vadd.f32 %v600_v25, %v6011_v27  ;;  %v714_v34 = vadd.f32 %v713_v26, %v6011_v27  ;;  %v6032_v17 = vld [vmem:[%s6925_s3] sm:$0xff] }
 0x10c   : > { %v1496_v46 = vmax.f32 %v599_v31, 0.0  ;;  %v1498_v47 = vmax.f32 %v712_v32, 0.0 }
 0x10d   : > { %v604_v35 = vpop.f32.mrb[14].mxu0  ;;  %v717_v36 = vpop.f32.mrb[14].mxu1  ;;  %5084 = vmatprep.subr.bf16.mxu0 %v5083_v28  ;;  %5100 = vmatprep.subr.bf16.mxu1 %v5099_v29  ;;  %v1497_v52 = vmax.f32 %v601_v33, 0.0  ;;  %v1499_v54 = vmax.f32 %v714_v34, 0.0 }
 0x10e   : > { %v605_v37 = vadd.f32 %v604_v35, %v6013_v30  ;;  %v718_v38 = vadd.f32 %v717_v36, %v6013_v30  ;;  %v606_v39 = vpop.f32.mrb[15].mxu0  ;;  %v719_v40 = vpop.f32.mrb[15].mxu1  ;;  %5086 = vmatpush1.bf16.msra.mxu0 %v5085_v23  ;;  %5102 = vmatpush1.bf16.msra.mxu1 %v5101_v24 }
 0x10f   : > { %v607_v44 = vadd.f32 %v606_v39, %v6013_v30  ;;  %v720_v45 = vadd.f32 %v719_v40, %v6013_v30  ;;  %v6044_v39 = vld [vmem:[%s6925_s3 + $0x8] sm:$0xff] }
 0x110   : > { %v1512_v50 = vmax.f32 %v605_v37, 0.0  ;;  %v1514_v51 = vmax.f32 %v718_v38, 0.0 }
 0x111   : > { %v1513_v55 = vmax.f32 %v607_v44, 0.0  ;;  %v1515_v57 = vmax.f32 %v720_v45, 0.0  ;;  %v788_v58 = vpop.f32.mrb[16].mxu0  ;;  %v901_v59 = vpop.f32.mrb[16].mxu1 }
 0x112   : > { %v5089_v60 = vpack.c.bf16 %v1512_v50, %v1496_v46  ;;  %v5105_v61 = vpack.c.bf16 %v1514_v51, %v1498_v47  ;;  %v790_v62 = vpop.f32.mrb[17].mxu0  ;;  %v903_v63 = vpop.f32.mrb[17].mxu1  ;;  %v789_v3 = vadd.f32 %v788_v58, %v5975_v43  ;;  %v902_v4 = vadd.f32 %v901_v59, %v5975_v43  ;;  %v6060_v59 = vld [vmem:[%s6925_s3 + $0x10] sm:$0xff] }
 0x113   : > { %v5087_v1 = vpack.c.bf16 %v1513_v55, %v1497_v52  ;;  %v5103_v2 = vpack.c.bf16 %v1515_v57, %v1499_v54  ;;  %v791_v5 = vadd.f32 %v790_v62, %v5975_v43  ;;  %v904_v6 = vadd.f32 %v903_v63, %v5975_v43 }
 0x114   : > { %v1404_v23 = vmax.f32 %v789_v3, 0.0  ;;  %v1406_v24 = vmax.f32 %v902_v4, 0.0 }
 0x115   : > { %v794_v7 = vpop.f32.mrb[18].mxu0  ;;  %v907_v8 = vpop.f32.mrb[18].mxu1  ;;  %5088 = vmatprep.subr.bf16.mxu0 %v5087_v1  ;;  %5104 = vmatprep.subr.bf16.mxu1 %v5103_v2  ;;  %v1405_v28 = vmax.f32 %v791_v5, 0.0  ;;  %v1407_v29 = vmax.f32 %v904_v6, 0.0 }
 0x116   : > { %v795_v11 = vadd.f32 %v794_v7, %v5977_v48  ;;  %v908_v12 = vadd.f32 %v907_v8, %v5977_v48  ;;  %v796_v15 = vpop.f32.mrb[19].mxu0  ;;  %v909_v16 = vpop.f32.mrb[19].mxu1  ;;  %5090 = vmatpush1.bf16.msra.mxu0 %v5089_v60  ;;  %5106 = vmatpush1.bf16.msra.mxu1 %v5105_v61 }
 0x117   : > { %v797_v20 = vadd.f32 %v796_v15, %v5977_v48  ;;  %v910_v22 = vadd.f32 %v909_v16, %v5977_v48 }
 0x118   : > { %v1420_v25 = vmax.f32 %v795_v11, 0.0  ;;  %v1422_v26 = vmax.f32 %v908_v12, 0.0 }
 0x119   : > { %v1421_v31 = vmax.f32 %v797_v20, 0.0  ;;  %v1423_v32 = vmax.f32 %v910_v22, 0.0  ;;  %v800_v33 = vpop.f32.mrb[20].mxu0  ;;  %v913_v34 = vpop.f32.mrb[20].mxu1  ;;  %4910 = vmatmul.mubr.msk.f32.vlgmr.msra.gmra.mrb[64].mxu0 %vm1584_vm2, %v6032_v17  ;;  %4918 = vmatmul.mubr.msk.f32.vlgmr.msra.gmra.mrb[64].mxu1 %vm1584_vm2, %v6032_v17  ;;  %v6074_v20 = vld [vmem:[%s6925_s3 + $0x18] sm:$0xff] }
 0x11a   : > { %v5109_v35 = vpack.c.bf16 %v1420_v25, %v1404_v23  ;;  %v5125_v36 = vpack.c.bf16 %v1422_v26, %v1406_v24  ;;  %v802_v37 = vpop.f32.mrb[21].mxu0  ;;  %v915_v38 = vpop.f32.mrb[21].mxu1  ;;  %1679 = vmatprep.mubr.f32.mxu0 %v5519_v0  ;;  %1792 = vmatprep.mubr.f32.mxu1 %v5519_v0  ;;  %v801_v45 = vadd.f32 %v800_v33, %v5979_v49 }
 0x11b   : > { %v5107_v40 = vpack.c.bf16 %v1421_v31, %v1405_v28  ;;  %v5123_v44 = vpack.c.bf16 %v1423_v32, %v1407_v29  ;;  %v914_v46 = vadd.f32 %v913_v34, %v5979_v49  ;;  %v803_v47 = vadd.f32 %v802_v37, %v5979_v49 }
 0x11c   : > { %v916_v50 = vadd.f32 %v915_v38, %v5979_v49  ;;  %v1436_v62 = vmax.f32 %v801_v45, 0.0 }
 0x11d   : > { %v806_v51 = vpop.f32.mrb[22].mxu0  ;;  %v919_v52 = vpop.f32.mrb[22].mxu1  ;;  %4911 = vmatmul.mubr.msk.f32.gmra.mrb[66].mxu0 %vm1584_vm2, %v6044_v39  ;;  %4919 = vmatmul.mubr.msk.f32.gmra.mrb[66].mxu1 %vm1584_vm2, %v6044_v39  ;;  %v1438_v63 = vmax.f32 %v914_v46, 0.0  ;;  %v1437_v3 = vmax.f32 %v803_v47, 0.0 }
 0x11e   : > { %v807_v54 = vadd.f32 %v806_v51, %v5989_v21  ;;  %v920_v55 = vadd.f32 %v919_v52, %v5989_v21  ;;  %5108 = vmatprep.subr.bf16.mxu0 %v5107_v40  ;;  %5124 = vmatprep.subr.bf16.mxu1 %v5123_v44  ;;  %v808_v57 = vpop.f32.mrb[23].mxu0  ;;  %v921_v58 = vpop.f32.mrb[23].mxu1  ;;  %v1439_v4 = vmax.f32 %v916_v50, 0.0 }
 0x11f   : > { %v809_v60 = vadd.f32 %v808_v57, %v5989_v21  ;;  %v922_v61 = vadd.f32 %v921_v58, %v5989_v21  ;;  %5110 = vmatpush1.bf16.msra.mxu0 %v5109_v35  ;;  %5126 = vmatpush1.bf16.msra.mxu1 %v5125_v36  ;;  %v6090_v36 = vld [vmem:[%s6925_s3 + $0x20] sm:$0xff] }
 0x120   : > { %v1452_v1 = vmax.f32 %v807_v54, 0.0  ;;  %v1454_v2 = vmax.f32 %v920_v55, 0.0  ;;  %1685 = vmatprep.mubr.f32.mxu0 %v5519_v0  ;;  %1798 = vmatprep.mubr.f32.mxu1 %v5519_v0 }
 0x121   : > { %v1453_v5 = vmax.f32 %v809_v60, 0.0  ;;  %v1455_v6 = vmax.f32 %v922_v61, 0.0  ;;  %v812_v7 = vpop.f32.mrb[24].mxu0  ;;  %v925_v8 = vpop.f32.mrb[24].mxu1  ;;  %4912 = vmatmul.mubr.msk.f32.gmra.mrb[68].mxu0 %vm1584_vm2, %v6060_v59  ;;  %4920 = vmatmul.mubr.msk.f32.gmra.mrb[68].mxu1 %vm1584_vm2, %v6060_v59 }
 0x122   : > { %v5113_v11 = vpack.c.bf16 %v1452_v1, %v1436_v62  ;;  %v5129_v12 = vpack.c.bf16 %v1454_v2, %v1438_v63  ;;  %v814_v15 = vpop.f32.mrb[25].mxu0  ;;  %v927_v16 = vpop.f32.mrb[25].mxu1  ;;  %1691 = vmatprep.mubr.f32.mxu0 %v5519_v0  ;;  %1804 = vmatprep.mubr.f32.mxu1 %v5519_v0  ;;  %v813_v24 = vadd.f32 %v812_v7, %v5999_v53  ;;  %v6104_v62 = vld [vmem:[%s6925_s3 + $0x28] sm:$0xff] }
 0x123   : > { %v5111_v22 = vpack.c.bf16 %v1453_v5, %v1437_v3  ;;  %v5127_v23 = vpack.c.bf16 %v1455_v6, %v1439_v4  ;;  %v926_v25 = vadd.f32 %v925_v8, %v5999_v53  ;;  %v815_v26 = vadd.f32 %v814_v15, %v5999_v53 }
 0x124   : > { %v928_v28 = vadd.f32 %v927_v16, %v5999_v53  ;;  %v1468_v40 = vmax.f32 %v813_v24, 0.0  ;;  %v6120_v16 = vld [vmem:[%s6925_s3 + $0x30] sm:$0xff] }
 0x125   : > { %v818_v29 = vpop.f32.mrb[26].mxu0  ;;  %v931_v31 = vpop.f32.mrb[26].mxu1  ;;  %4913 = vmatmul.mubr.msk.f32.gmra.mrb[70].mxu0 %vm1584_vm2, %v6074_v20  ;;  %4921 = vmatmul.mubr.msk.f32.gmra.mrb[70].mxu1 %vm1584_vm2, %v6074_v20  ;;  %v1470_v44 = vmax.f32 %v926_v25, 0.0  ;;  %v1469_v47 = vmax.f32 %v815_v26, 0.0 }
 0x126   : > { %v819_v32 = vadd.f32 %v818_v29, %v6001_v56  ;;  %v932_v33 = vadd.f32 %v931_v31, %v6001_v56  ;;  %5112 = vmatprep.subr.bf16.mxu0 %v5111_v22  ;;  %5128 = vmatprep.subr.bf16.mxu1 %v5127_v23  ;;  %v820_v34 = vpop.f32.mrb[27].mxu0  ;;  %v933_v35 = vpop.f32.mrb[27].mxu1  ;;  %v1471_v50 = vmax.f32 %v928_v28, 0.0 }
 0x127   : > { %v821_v37 = vadd.f32 %v820_v34, %v6001_v56  ;;  %v934_v38 = vadd.f32 %v933_v35, %v6001_v56  ;;  %5114 = vmatpush1.bf16.msra.mxu0 %v5113_v11  ;;  %5130 = vmatpush1.bf16.msra.mxu1 %v5129_v12 }
 0x128   : > { %v1484_v45 = vmax.f32 %v819_v32, 0.0  ;;  %v1486_v46 = vmax.f32 %v932_v33, 0.0  ;;  %1697 = vmatprep.mubr.f32.mxu0 %v5519_v0  ;;  %1810 = vmatprep.mubr.f32.mxu1 %v5519_v0 }
 0x129   : > { %v1485_v51 = vmax.f32 %v821_v37, 0.0  ;;  %v1487_v52 = vmax.f32 %v934_v38, 0.0  ;;  %v824_v54 = vpop.f32.mrb[28].mxu0  ;;  %v937_v55 = vpop.f32.mrb[28].mxu1  ;;  %4914 = vmatmul.mubr.msk.f32.gmra.mrb[72].mxu0 %vm1584_vm2, %v6090_v36  ;;  %4922 = vmatmul.mubr.msk.f32.gmra.mrb[72].mxu1 %vm1584_vm2, %v6090_v36 }
 0x12a   : > { %v5117_v57 = vpack.c.bf16 %v1484_v45, %v1468_v40  ;;  %v5133_v58 = vpack.c.bf16 %v1486_v46, %v1470_v44  ;;  %v826_v60 = vpop.f32.mrb[29].mxu0  ;;  %v939_v61 = vpop.f32.mrb[29].mxu1  ;;  %1703 = vmatprep.mubr.f32.mxu0 %v5519_v0  ;;  %1816 = vmatprep.mubr.f32.mxu1 %v5519_v0  ;;  %v825_v2 = vadd.f32 %v824_v54, %v6011_v27  ;;  %v6134_v45 = vld [vmem:[%s6925_s3 + $0x38] sm:$0xff] }
 0x12b   : > { %v5115_v63 = vpack.c.bf16 %v1485_v51, %v1469_v47  ;;  %v5131_v1 = vpack.c.bf16 %v1487_v52, %v1471_v50  ;;  %v938_v3 = vadd.f32 %v937_v55, %v6011_v27  ;;  %v827_v4 = vadd.f32 %v826_v60, %v6011_v27 }
 0x12c   : > { %v940_v5 = vadd.f32 %v939_v61, %v6011_v27  ;;  %v1500_v24 = vmax.f32 %v825_v2, 0.0 }
 0x12d   : > { %v830_v6 = vpop.f32.mrb[30].mxu0  ;;  %v943_v7 = vpop.f32.mrb[30].mxu1  ;;  %4915 = vmatmul.mubr.msk.f32.gmra.mrb[74].mxu0 %vm1584_vm2, %v6104_v62  ;;  %4923 = vmatmul.mubr.msk.f32.gmra.mrb[74].mxu1 %vm1584_vm2, %v6104_v62  ;;  %v1502_v25 = vmax.f32 %v938_v3, 0.0  ;;  %v1501_v29 = vmax.f32 %v827_v4, 0.0 }
 0x12e   : > { %v831_v8 = vadd.f32 %v830_v6, %v6013_v30  ;;  %v944_v11 = vadd.f32 %v943_v7, %v6013_v30  ;;  %5116 = vmatprep.subr.bf16.mxu0 %v5115_v63  ;;  %5132 = vmatprep.subr.bf16.mxu1 %v5131_v1  ;;  %v832_v12 = vpop.f32.mrb[31].mxu0  ;;  %v945_v15 = vpop.f32.mrb[31].mxu1  ;;  %v1503_v31 = vmax.f32 %v940_v5, 0.0 }
 0x12f   : > { %v833_v22 = vadd.f32 %v832_v12, %v6013_v30  ;;  %v946_v23 = vadd.f32 %v945_v15, %v6013_v30  ;;  %5118 = vmatpush1.bf16.msra.mxu0 %v5117_v57  ;;  %5134 = vmatpush1.bf16.msra.mxu1 %v5133_v58 }
 0x130   : > { %v1516_v26 = vmax.f32 %v831_v8, 0.0  ;;  %v1518_v28 = vmax.f32 %v944_v11, 0.0  ;;  %1709 = vmatprep.mubr.f32.mxu0 %v5519_v0  ;;  %1822 = vmatprep.mubr.f32.mxu1 %v5519_v0 }
 0x131   : > { %v1517_v32 = vmax.f32 %v833_v22, 0.0  ;;  %v1519_v33 = vmax.f32 %v946_v23, 0.0  ;;  %v1014_v34 = vpop.f32.mrb[32].mxu0  ;;  %v1127_v35 = vpop.f32.mrb[32].mxu1  ;;  %4916 = vmatmul.mubr.msk.f32.gmra.mrb[76].mxu0 %vm1584_vm2, %v6120_v16  ;;  %4924 = vmatmul.mubr.msk.f32.gmra.mrb[76].mxu1 %vm1584_vm2, %v6120_v16 }
 0x132   : > { %v5121_v37 = vpack.c.bf16 %v1516_v26, %v1500_v24  ;;  %v5137_v38 = vpack.c.bf16 %v1518_v28, %v1502_v25  ;;  %v1016_v40 = vpop.f32.mrb[33].mxu0  ;;  %v1129_v44 = vpop.f32.mrb[33].mxu1  ;;  %1715 = vmatprep.mubr.f32.mxu0 %v5519_v0  ;;  %1828 = vmatprep.mubr.f32.mxu1 %v5519_v0  ;;  %v1015_v50 = vadd.f32 %v1014_v34, %v5975_v43 }
 0x133   : > { %v5119_v46 = vpack.c.bf16 %v1517_v32, %v1501_v29  ;;  %v5135_v47 = vpack.c.bf16 %v1519_v33, %v1503_v31  ;;  %v1128_v51 = vadd.f32 %v1127_v35, %v5975_v43  ;;  %v1017_v52 = vadd.f32 %v1016_v40, %v5975_v43 }
 0x134   : > { %v1130_v54 = vadd.f32 %v1129_v44, %v5975_v43  ;;  %v1408_v3 = vmax.f32 %v1015_v50, 0.0 }
 0x135   : > { %v1020_v55 = vpop.f32.mrb[34].mxu0  ;;  %v1133_v57 = vpop.f32.mrb[34].mxu1  ;;  %4917 = vmatmul.mubr.msk.f32.gmra.mrb[78].mxu0 %vm1584_vm2, %v6134_v45  ;;  %4925 = vmatmul.mubr.msk.f32.gmra.mrb[78].mxu1 %vm1584_vm2, %v6134_v45  ;;  %v1410_v4 = vmax.f32 %v1128_v51, 0.0  ;;  %v1409_v7 = vmax.f32 %v1017_v52, 0.0 }
 0x136   : > { %v1021_v58 = vadd.f32 %v1020_v55, %v5977_v48  ;;  %v1134_v60 = vadd.f32 %v1133_v57, %v5977_v48  ;;  %5120 = vmatprep.subr.bf16.mxu0 %v5119_v46  ;;  %5136 = vmatprep.subr.bf16.mxu1 %v5135_v47  ;;  %v1022_v61 = vpop.f32.mrb[35].mxu0  ;;  %v1135_v63 = vpop.f32.mrb[35].mxu1  ;;  %v1411_v8 = vmax.f32 %v1130_v54, 0.0 }
 0x137   : > { %v1023_v1 = vadd.f32 %v1022_v61, %v5977_v48  ;;  %v1136_v2 = vadd.f32 %v1135_v63, %v5977_v48  ;;  %5122 = vmatpush1.bf16.msra.mxu0 %v5121_v37  ;;  %5138 = vmatpush1.bf16.msra.mxu1 %v5137_v38 }
 0x138   : > { %v1424_v5 = vmax.f32 %v1021_v58, 0.0  ;;  %v1426_v6 = vmax.f32 %v1134_v60, 0.0  ;;  %1899 = vmatprep.mubr.f32.mxu0 %v5519_v0  ;;  %2012 = vmatprep.mubr.f32.mxu1 %v5519_v0 }
 0x139   : > { %v1425_v11 = vmax.f32 %v1023_v1, 0.0  ;;  %v1427_v12 = vmax.f32 %v1136_v2, 0.0  ;;  %v1026_v15 = vpop.f32.mrb[36].mxu0  ;;  %v1139_v22 = vpop.f32.mrb[36].mxu1 }
 0x13a   : > { %v5141_v23 = vpack.c.bf16 %v1424_v5, %v1408_v3  ;;  %v5157_v24 = vpack.c.bf16 %v1426_v6, %v1410_v4  ;;  %4926 = vmatmul.mubr.msk.f32.vlgmr.msra.gmra.mrb[80].mxu0 %vm1584_vm2, %v6032_v17  ;;  %v1028_v25 = vpop.f32.mrb[37].mxu0  ;;  %v1141_v26 = vpop.f32.mrb[37].mxu1  ;;  %4934 = vmatmul.mubr.msk.f32.vlgmr.msra.gmra.mrb[80].mxu1 %vm1584_vm2, %v6032_v17  ;;  %v1027_v31 = vadd.f32 %v1026_v15, %v5979_v49 }
 0x13b   : > { %v5139_v28 = vpack.c.bf16 %v1425_v11, %v1409_v7  ;;  %v5155_v29 = vpack.c.bf16 %v1427_v12, %v1411_v8  ;;  %v1140_v32 = vadd.f32 %v1139_v22, %v5979_v49  ;;  %1905 = vmatprep.mubr.f32.mxu0 %v5519_v0  ;;  %2018 = vmatprep.mubr.f32.mxu1 %v5519_v0 }
 0x13c   : > { %v1029_v33 = vadd.f32 %v1028_v25, %v5979_v49  ;;  %v1142_v34 = vadd.f32 %v1141_v26, %v5979_v49  ;;  %v1440_v51 = vmax.f32 %v1027_v31, 0.0 }
 0x13d   : > { %v1032_v35 = vpop.f32.mrb[38].mxu0  ;;  %v1145_v37 = vpop.f32.mrb[38].mxu1  ;;  %5140 = vmatprep.subr.bf16.mxu0 %v5139_v28  ;;  %5156 = vmatprep.subr.bf16.mxu1 %v5155_v29  ;;  %v1442_v52 = vmax.f32 %v1140_v32, 0.0 }
 0x13e   : > { %v1033_v38 = vadd.f32 %v1032_v35, %v5989_v21  ;;  %v1146_v40 = vadd.f32 %v1145_v37, %v5989_v21  ;;  %4927 = vmatmul.mubr.msk.f32.gmra.mrb[82].mxu0 %vm1584_vm2, %v6044_v39  ;;  %v1034_v44 = vpop.f32.mrb[39].mxu0  ;;  %v1147_v46 = vpop.f32.mrb[39].mxu1  ;;  %5158 = vmatpush1.bf16.msra.mxu1 %v5157_v24  ;;  %v1441_v57 = vmax.f32 %v1029_v33, 0.0  ;;  %v1443_v58 = vmax.f32 %v1142_v34, 0.0 }
 0x13f   : > { %4935 = vmatmul.mubr.msk.f32.gmra.mrb[82].mxu1 %vm1584_vm2, %v6044_v39  ;;  %v1035_v47 = vadd.f32 %v1034_v44, %v5989_v21  ;;  %v1148_v50 = vadd.f32 %v1147_v46, %v5989_v21  ;;  %5142 = vmatpush1.bf16.msra.mxu0 %v5141_v23 }
 0x140   : > { %v1456_v54 = vmax.f32 %v1033_v38, 0.0  ;;  %v1458_v55 = vmax.f32 %v1146_v40, 0.0  ;;  %1911 = vmatprep.mubr.f32.mxu0 %v5519_v0  ;;  %2024 = vmatprep.mubr.f32.mxu1 %v5519_v0 }
 0x141   : > { %v1457_v60 = vmax.f32 %v1035_v47, 0.0  ;;  %v1459_v61 = vmax.f32 %v1148_v50, 0.0  ;;  %v1038_v63 = vpop.f32.mrb[40].mxu0  ;;  %v1151_v1 = vpop.f32.mrb[40].mxu1 }
 0x142   : > { %v5145_v2 = vpack.c.bf16 %v1456_v54, %v1440_v51  ;;  %v5161_v3 = vpack.c.bf16 %v1458_v55, %v1442_v52  ;;  %4928 = vmatmul.mubr.msk.f32.gmra.mrb[84].mxu0 %vm1584_vm2, %v6060_v59  ;;  %v1040_v4 = vpop.f32.mrb[41].mxu0  ;;  %v1153_v5 = vpop.f32.mrb[41].mxu1  ;;  %v1039_v8 = vadd.f32 %v1038_v63, %v5999_v53  ;;  %v1152_v11 = vadd.f32 %v1151_v1, %v5999_v53 }
 0x143   : > { %v5143_v6 = vpack.c.bf16 %v1457_v60, %v1441_v57  ;;  %v5159_v7 = vpack.c.bf16 %v1459_v61, %v1443_v58  ;;  %4936 = vmatmul.mubr.msk.f32.gmra.mrb[84].mxu1 %vm1584_vm2, %v6060_v59  ;;  %1917 = vmatprep.mubr.f32.mxu0 %v5519_v0  ;;  %v1041_v12 = vadd.f32 %v1040_v4, %v5999_v53 }
 0x144   : > { %2030 = vmatprep.mubr.f32.mxu1 %v5519_v0  ;;  %v1154_v15 = vadd.f32 %v1153_v5, %v5999_v53  ;;  %v1472_v32 = vmax.f32 %v1039_v8, 0.0  ;;  %v1474_v33 = vmax.f32 %v1152_v11, 0.0 }
 0x145   : > { %v1044_v22 = vpop.f32.mrb[42].mxu0  ;;  %v1157_v23 = vpop.f32.mrb[42].mxu1  ;;  %5144 = vmatprep.subr.bf16.mxu0 %v5143_v6  ;;  %5160 = vmatprep.subr.bf16.mxu1 %v5159_v7  ;;  %v1473_v37 = vmax.f32 %v1041_v12, 0.0 }
 0x146   : > { %v1045_v24 = vadd.f32 %v1044_v22, %v6001_v56  ;;  %v1158_v25 = vadd.f32 %v1157_v23, %v6001_v56  ;;  %4929 = vmatmul.mubr.msk.f32.gmra.mrb[86].mxu0 %vm1584_vm2, %v6074_v20  ;;  %v1046_v26 = vpop.f32.mrb[43].mxu0  ;;  %v1159_v28 = vpop.f32.mrb[43].mxu1  ;;  %5162 = vmatpush1.bf16.msra.mxu1 %v5161_v3  ;;  %v1475_v38 = vmax.f32 %v1154_v15, 0.0 }
 0x147   : > { %4937 = vmatmul.mubr.msk.f32.gmra.mrb[86].mxu1 %vm1584_vm2, %v6074_v20  ;;  %v1047_v29 = vadd.f32 %v1046_v26, %v6001_v56  ;;  %v1160_v31 = vadd.f32 %v1159_v28, %v6001_v56  ;;  %5146 = vmatpush1.bf16.msra.mxu0 %v5145_v2 }
 0x148   : > { %v1488_v34 = vmax.f32 %v1045_v24, 0.0  ;;  %v1490_v35 = vmax.f32 %v1158_v25, 0.0  ;;  %1923 = vmatprep.mubr.f32.mxu0 %v5519_v0  ;;  %2036 = vmatprep.mubr.f32.mxu1 %v5519_v0 }
 0x149   : > { %v1489_v40 = vmax.f32 %v1047_v29, 0.0  ;;  %v1491_v44 = vmax.f32 %v1160_v31, 0.0  ;;  %v1050_v46 = vpop.f32.mrb[44].mxu0  ;;  %v1163_v47 = vpop.f32.mrb[44].mxu1 }
 0x14a   : > { %v5149_v50 = vpack.c.bf16 %v1488_v34, %v1472_v32  ;;  %v5165_v51 = vpack.c.bf16 %v1490_v35, %v1474_v33  ;;  %4930 = vmatmul.mubr.msk.f32.gmra.mrb[88].mxu0 %vm1584_vm2, %v6090_v36  ;;  %v1052_v52 = vpop.f32.mrb[45].mxu0  ;;  %v1165_v54 = vpop.f32.mrb[45].mxu1  ;;  %v1051_v58 = vadd.f32 %v1050_v46, %v6011_v27  ;;  %v1164_v60 = vadd.f32 %v1163_v47, %v6011_v27 }
 0x14b   : > { %v5147_v55 = vpack.c.bf16 %v1489_v40, %v1473_v37  ;;  %v5163_v57 = vpack.c.bf16 %v1491_v44, %v1475_v38  ;;  %4938 = vmatmul.mubr.msk.f32.gmra.mrb[88].mxu1 %vm1584_vm2, %v6090_v36  ;;  %1929 = vmatprep.mubr.f32.mxu0 %v5519_v0  ;;  %v1053_v61 = vadd.f32 %v1052_v52, %v6011_v27 }
 0x14c   : > { %2042 = vmatprep.mubr.f32.mxu1 %v5519_v0  ;;  %v1166_v63 = vadd.f32 %v1165_v54, %v6011_v27  ;;  %v1504_v11 = vmax.f32 %v1051_v58, 0.0  ;;  %v1506_v12 = vmax.f32 %v1164_v60, 0.0 }
 0x14d   : > { %v1056_v1 = vpop.f32.mrb[46].mxu0  ;;  %v1169_v2 = vpop.f32.mrb[46].mxu1  ;;  %5148 = vmatprep.subr.bf16.mxu0 %v5147_v55  ;;  %5164 = vmatprep.subr.bf16.mxu1 %v5163_v57  ;;  %v1505_v23 = vmax.f32 %v1053_v61, 0.0 }
 0x14e   : > { %v1057_v3 = vadd.f32 %v1056_v1, %v6013_v30  ;;  %v1170_v4 = vadd.f32 %v1169_v2, %v6013_v30  ;;  %4931 = vmatmul.mubr.msk.f32.gmra.mrb[90].mxu0 %vm1584_vm2, %v6104_v62  ;;  %v1058_v5 = vpop.f32.mrb[47].mxu0  ;;  %v1171_v6 = vpop.f32.mrb[47].mxu1  ;;  %5166 = vmatpush1.bf16.msra.mxu1 %v5165_v51  ;;  %v1507_v24 = vmax.f32 %v1166_v63, 0.0 }
 0x14f   : > { %4939 = vmatmul.mubr.msk.f32.gmra.mrb[90].mxu1 %vm1584_vm2, %v6104_v62  ;;  %v1059_v7 = vadd.f32 %v1058_v5, %v6013_v30  ;;  %v1172_v8 = vadd.f32 %v1171_v6, %v6013_v30  ;;  %5150 = vmatpush1.bf16.msra.mxu0 %v5149_v50 }
 0x150   : > { %v1520_v15 = vmax.f32 %v1057_v3, 0.0  ;;  %v1522_v22 = vmax.f32 %v1170_v4, 0.0  ;;  %1935 = vmatprep.mubr.f32.mxu0 %v5519_v0  ;;  %2048 = vmatprep.mubr.f32.mxu1 %v5519_v0 }
 0x151   : > { %v1521_v25 = vmax.f32 %v1059_v7, 0.0  ;;  %v1523_v26 = vmax.f32 %v1172_v8, 0.0  ;;  %v1240_v28 = vpop.f32.mrb[48].mxu0  ;;  %v1353_v29 = vpop.f32.mrb[48].mxu1 }
 0x152   : > { %v5153_v31 = vpack.c.bf16 %v1520_v15, %v1504_v11  ;;  %v5169_v32 = vpack.c.bf16 %v1522_v22, %v1506_v12  ;;  %4932 = vmatmul.mubr.msk.f32.gmra.mrb[92].mxu0 %vm1584_vm2, %v6120_v16  ;;  %v1242_v33 = vpop.f32.mrb[49].mxu0  ;;  %v1355_v34 = vpop.f32.mrb[49].mxu1  ;;  %v1241_v38 = vadd.f32 %v1240_v28, %v5975_v43  ;;  %v1354_v40 = vadd.f32 %v1353_v29, %v5975_v43 }
 0x153   : > { %v5151_v35 = vpack.c.bf16 %v1521_v25, %v1505_v23  ;;  %v5167_v37 = vpack.c.bf16 %v1523_v26, %v1507_v24  ;;  %4940 = vmatmul.mubr.msk.f32.gmra.mrb[92].mxu1 %vm1584_vm2, %v6120_v16  ;;  %1941 = vmatprep.mubr.f32.mxu0 %v5519_v0  ;;  %v1243_v44 = vadd.f32 %v1242_v33, %v5975_v43 }
 0x154   : > { %2054 = vmatprep.mubr.f32.mxu1 %v5519_v0  ;;  %v1356_v46 = vadd.f32 %v1355_v34, %v5975_v43  ;;  %v1412_v58 = vmax.f32 %v1241_v38, 0.0  ;;  %v1414_v60 = vmax.f32 %v1354_v40, 0.0 }
 0x155   : > { %v1246_v47 = vpop.f32.mrb[50].mxu0  ;;  %v1359_v50 = vpop.f32.mrb[50].mxu1  ;;  %5152 = vmatprep.subr.bf16.mxu0 %v5151_v35  ;;  %5168 = vmatprep.subr.bf16.mxu1 %v5167_v37  ;;  %v1413_v1 = vmax.f32 %v1243_v44, 0.0 }
 0x156   : > { %v1247_v51 = vadd.f32 %v1246_v47, %v5977_v48  ;;  %v1360_v52 = vadd.f32 %v1359_v50, %v5977_v48  ;;  %4933 = vmatmul.mubr.msk.f32.gmra.mrb[94].mxu0 %vm1584_vm2, %v6134_v45  ;;  %v1248_v54 = vpop.f32.mrb[51].mxu0  ;;  %v1361_v55 = vpop.f32.mrb[51].mxu1  ;;  %5170 = vmatpush1.bf16.msra.mxu1 %v5169_v32  ;;  %v1415_v2 = vmax.f32 %v1356_v46, 0.0 }
 0x157   : > { %4941 = vmatmul.mubr.msk.f32.gmra.mrb[94].mxu1 %vm1584_vm2, %v6134_v45  ;;  %v1249_v57 = vadd.f32 %v1248_v54, %v5977_v48  ;;  %v1362_v43 = vadd.f32 %v1361_v55, %v5977_v48  ;;  %5154 = vmatpush1.bf16.msra.mxu0 %v5153_v31 }
 0x158   : > { %v1428_v61 = vmax.f32 %v1247_v51, 0.0  ;;  %v1430_v63 = vmax.f32 %v1360_v52, 0.0  ;;  %2125 = vmatprep.mubr.f32.mxu0 %v5519_v0  ;;  %2238 = vmatprep.mubr.f32.mxu1 %v5519_v0 }
 0x159   : > { %v1429_v3 = vmax.f32 %v1249_v57, 0.0  ;;  %v1431_v4 = vmax.f32 %v1362_v43, 0.0  ;;  %v1252_v5 = vpop.f32.mrb[52].mxu0  ;;  %v1365_v6 = vpop.f32.mrb[52].mxu1 }
 0x15a   : > { %v5173_v7 = vpack.c.bf16 %v1428_v61, %v1412_v58  ;;  %v5189_v8 = vpack.c.bf16 %v1430_v63, %v1414_v60  ;;  %4942 = vmatmul.mubr.msk.f32.vlgmr.msra.gmra.mrb[96].mxu0 %vm1584_vm2, %v6032_v17  ;;  %v1254_v48 = vpop.f32.mrb[53].mxu0  ;;  %v1367_v11 = vpop.f32.mrb[53].mxu1  ;;  %v1253_v22 = vadd.f32 %v1252_v5, %v5979_v49  ;;  %v1366_v23 = vadd.f32 %v1365_v6, %v5979_v49 }
 0x15b   : > { %v5171_v12 = vpack.c.bf16 %v1429_v3, %v1413_v1  ;;  %v5187_v15 = vpack.c.bf16 %v1431_v4, %v1415_v2  ;;  %4950 = vmatmul.mubr.msk.f32.vlgmr.msra.gmra.mrb[96].mxu1 %vm1584_vm2, %v6032_v17  ;;  %2131 = vmatprep.mubr.f32.mxu0 %v5519_v0  ;;  %v1255_v24 = vadd.f32 %v1254_v48, %v5979_v49 }
 0x15c   : > { %2244 = vmatprep.mubr.f32.mxu1 %v5519_v0  ;;  %v1368_v25 = vadd.f32 %v1367_v11, %v5979_v49  ;;  %v1444_v35 = vmax.f32 %v1253_v22, 0.0  ;;  %v1446_v37 = vmax.f32 %v1366_v23, 0.0 }
 0x15d   : > { %v1258_v26 = vpop.f32.mrb[54].mxu0  ;;  %v1371_v28 = vpop.f32.mrb[54].mxu1  ;;  %5172 = vmatprep.subr.bf16.mxu0 %v5171_v12  ;;  %5188 = vmatprep.subr.bf16.mxu1 %v5187_v15  ;;  %v1445_v44 = vmax.f32 %v1255_v24, 0.0 }
 0x15e   : > { %v1259_v29 = vadd.f32 %v1258_v26, %v5989_v21  ;;  %v1372_v31 = vadd.f32 %v1371_v28, %v5989_v21  ;;  %4943 = vmatmul.mubr.msk.f32.gmra.mrb[98].mxu0 %vm1584_vm2, %v6044_v39  ;;  %v1260_v32 = vpop.f32.mrb[55].mxu0  ;;  %v1373_v33 = vpop.f32.mrb[55].mxu1  ;;  %5190 = vmatpush1.bf16.msra.mxu1 %v5189_v8  ;;  %v1447_v46 = vmax.f32 %v1368_v25, 0.0 }
 0x15f   : > { %4951 = vmatmul.mubr.msk.f32.gmra.mrb[98].mxu1 %vm1584_vm2, %v6044_v39  ;;  %v1261_v34 = vadd.f32 %v1260_v32, %v5989_v21  ;;  %v1374_v49 = vadd.f32 %v1373_v33, %v5989_v21  ;;  %5174 = vmatpush1.bf16.msra.mxu0 %v5173_v7 }
 0x160   : > { %v1460_v38 = vmax.f32 %v1259_v29, 0.0  ;;  %v1462_v40 = vmax.f32 %v1372_v31, 0.0  ;;  %2137 = vmatprep.mubr.f32.mxu0 %v5519_v0  ;;  %2250 = vmatprep.mubr.f32.mxu1 %v5519_v0 }
 0x161   : > { %v1461_v47 = vmax.f32 %v1261_v34, 0.0  ;;  %v1463_v50 = vmax.f32 %v1374_v49, 0.0  ;;  %v1264_v51 = vpop.f32.mrb[56].mxu0  ;;  %v1377_v52 = vpop.f32.mrb[56].mxu1 }
 0x162   : > { %v5177_v54 = vpack.c.bf16 %v1460_v38, %v1444_v35  ;;  %v5193_v55 = vpack.c.bf16 %v1462_v40, %v1446_v37  ;;  %4944 = vmatmul.mubr.msk.f32.gmra.mrb[100].mxu0 %vm1584_vm2, %v6060_v59  ;;  %v1266_v21 = vpop.f32.mrb[57].mxu0  ;;  %v1379_v57 = vpop.f32.mrb[57].mxu1  ;;  %v1265_v60 = vadd.f32 %v1264_v51, %v5999_v53  ;;  %v1378_v61 = vadd.f32 %v1377_v52, %v5999_v53 }
 0x163   : > { %v5175_v43 = vpack.c.bf16 %v1461_v47, %v1445_v44  ;;  %v5191_v58 = vpack.c.bf16 %v1463_v50, %v1447_v46  ;;  %4952 = vmatmul.mubr.msk.f32.gmra.mrb[100].mxu1 %vm1584_vm2, %v6060_v59  ;;  %2143 = vmatprep.mubr.f32.mxu0 %v5519_v0  ;;  %v1267_v63 = vadd.f32 %v1266_v21, %v5999_v53 }
 0x164   : > { %2256 = vmatprep.mubr.f32.mxu1 %v5519_v0  ;;  %v1380_v1 = vadd.f32 %v1379_v57, %v5999_v53  ;;  %v1476_v48 = vmax.f32 %v1265_v60, 0.0  ;;  %v1478_v11 = vmax.f32 %v1378_v61, 0.0 }
 0x165   : > { %v1270_v2 = vpop.f32.mrb[58].mxu0  ;;  %v1383_v3 = vpop.f32.mrb[58].mxu1  ;;  %5176 = vmatprep.subr.bf16.mxu0 %v5175_v43  ;;  %5192 = vmatprep.subr.bf16.mxu1 %v5191_v58  ;;  %v1477_v22 = vmax.f32 %v1267_v63, 0.0 }
 0x166   : > { %v1271_v4 = vadd.f32 %v1270_v2, %v6001_v56  ;;  %v1384_v5 = vadd.f32 %v1383_v3, %v6001_v56  ;;  %4945 = vmatmul.mubr.msk.f32.gmra.mrb[102].mxu0 %vm1584_vm2, %v6074_v20  ;;  %v1272_v6 = vpop.f32.mrb[59].mxu0  ;;  %v1385_v7 = vpop.f32.mrb[59].mxu1  ;;  %5194 = vmatpush1.bf16.msra.mxu1 %v5193_v55  ;;  %v1479_v23 = vmax.f32 %v1380_v1, 0.0 }
 0x167   : > { %4953 = vmatmul.mubr.msk.f32.gmra.mrb[102].mxu1 %vm1584_vm2, %v6074_v20  ;;  %v1273_v8 = vadd.f32 %v1272_v6, %v6001_v56  ;;  %v1386_v53 = vadd.f32 %v1385_v7, %v6001_v56  ;;  %5178 = vmatpush1.bf16.msra.mxu0 %v5177_v54 }
 0x168   : > { %v1492_v12 = vmax.f32 %v1271_v4, 0.0  ;;  %v1494_v15 = vmax.f32 %v1384_v5, 0.0  ;;  %2149 = vmatprep.mubr.f32.mxu0 %v5519_v0  ;;  %2262 = vmatprep.mubr.f32.mxu1 %v5519_v0 }
 0x169   : > { %v1493_v24 = vmax.f32 %v1273_v8, 0.0  ;;  %v1495_v25 = vmax.f32 %v1386_v53, 0.0  ;;  %v1276_v26 = vpop.f32.mrb[60].mxu0  ;;  %v1389_v28 = vpop.f32.mrb[60].mxu1 }
 0x16a   : > { %v5181_v29 = vpack.c.bf16 %v1492_v12, %v1476_v48  ;;  %v5197_v31 = vpack.c.bf16 %v1494_v15, %v1478_v11  ;;  %4946 = vmatmul.mubr.msk.f32.gmra.mrb[104].mxu0 %vm1584_vm2, %v6090_v36  ;;  %v1278_v56 = vpop.f32.mrb[61].mxu0  ;;  %v1391_v32 = vpop.f32.mrb[61].mxu1  ;;  %v1277_v49 = vadd.f32 %v1276_v26, %v6011_v27  ;;  %v1390_v35 = vadd.f32 %v1389_v28, %v6011_v27 }
 0x16b   : > { %v5179_v33 = vpack.c.bf16 %v1493_v24, %v1477_v22  ;;  %v5195_v34 = vpack.c.bf16 %v1495_v25, %v1479_v23  ;;  %4954 = vmatmul.mubr.msk.f32.gmra.mrb[104].mxu1 %vm1584_vm2, %v6090_v36  ;;  %2155 = vmatprep.mubr.f32.mxu0 %v5519_v0  ;;  %v1279_v37 = vadd.f32 %v1278_v56, %v6011_v27 }
 0x16c   : > { %2268 = vmatprep.mubr.f32.mxu1 %v5519_v0  ;;  %v1392_v38 = vadd.f32 %v1391_v32, %v6011_v27  ;;  %v1508_v54 = vmax.f32 %v1277_v49, 0.0  ;;  %v1510_v55 = vmax.f32 %v1390_v35, 0.0 }
 0x16d   : > { %v1282_v40 = vpop.f32.mrb[62].mxu0  ;;  %v1395_v44 = vpop.f32.mrb[62].mxu1  ;;  %5180 = vmatprep.subr.bf16.mxu0 %v5179_v33  ;;  %5196 = vmatprep.subr.bf16.mxu1 %v5195_v34  ;;  %v1509_v43 = vmax.f32 %v1279_v37, 0.0 }
 0x16e   : > { %v1283_v46 = vadd.f32 %v1282_v40, %v6013_v30  ;;  %v1396_v47 = vadd.f32 %v1395_v44, %v6013_v30  ;;  %4947 = vmatmul.mubr.msk.f32.gmra.mrb[106].mxu0 %vm1584_vm2, %v6104_v62  ;;  %v1284_v50 = vpop.f32.mrb[63].mxu0  ;;  %v1397_v51 = vpop.f32.mrb[63].mxu1  ;;  %5198 = vmatpush1.bf16.msra.mxu1 %v5197_v31  ;;  %v1511_v58 = vmax.f32 %v1392_v38, 0.0 }
 0x16f   : > { %4955 = vmatmul.mubr.msk.f32.gmra.mrb[106].mxu1 %vm1584_vm2, %v6104_v62  ;;  %v1285_v52 = vadd.f32 %v1284_v50, %v6013_v30  ;;  %v1398_v27 = vadd.f32 %v1397_v51, %v6013_v30  ;;  %5182 = vmatpush1.bf16.msra.mxu0 %v5181_v29 }
 0x170   : > { %v1524_v21 = vmax.f32 %v1283_v46, 0.0  ;;  %v1526_v57 = vmax.f32 %v1396_v47, 0.0  ;;  %2161 = vmatprep.mubr.f32.mxu0 %v5519_v0  ;;  %2274 = vmatprep.mubr.f32.mxu1 %v5519_v0 }
 0x171   : > { %v1525_v60 = vmax.f32 %v1285_v52, 0.0  ;;  %v1527_v61 = vmax.f32 %v1398_v27, 0.0 }
 0x172   : > { %v5185_v63 = vpack.c.bf16 %v1524_v21, %v1508_v54  ;;  %v5201_v1 = vpack.c.bf16 %v1526_v57, %v1510_v55  ;;  %4948 = vmatmul.mubr.msk.f32.gmra.mrb[108].mxu0 %vm1584_vm2, %v6120_v16 }
 0x173   : > { %v5183_v2 = vpack.c.bf16 %v1525_v60, %v1509_v43  ;;  %v5199_v30 = vpack.c.bf16 %v1527_v61, %v1511_v58  ;;  %4956 = vmatmul.mubr.msk.f32.gmra.mrb[108].mxu1 %vm1584_vm2, %v6120_v16  ;;  %2167 = vmatprep.mubr.f32.mxu0 %v5519_v0 }
 0x174   : > { %2280 = vmatprep.mubr.f32.mxu1 %v5519_v0 }
 0x175   : > { %5184 = vmatprep.subr.bf16.mxu0 %v5183_v2  ;;  %5200 = vmatprep.subr.bf16.mxu1 %v5199_v30 }
 0x176   : > { %4949 = vmatmul.mubr.msk.f32.gmra.mrb[110].mxu0 %vm1584_vm2, %v6134_v45  ;;  %5202 = vmatpush1.bf16.msra.mxu1 %v5201_v1 }
 0x177   : > { %4957 = vmatmul.mubr.msk.f32.gmra.mrb[110].mxu1 %vm1584_vm2, %v6134_v45  ;;  %5186 = vmatpush1.bf16.msra.mxu0 %v5185_v63 }
 0x178   : > { %2351 = vmatprep.mubr.f32.mxu0 %v5519_v0  ;;  %2464 = vmatprep.mubr.f32.mxu1 %v5519_v0 }
 0x17a   : > { %4958 = vmatmul.mubr.msk.f32.vlgmr.msra.gmra.mrb[112].mxu0 %vm1584_vm2, %v6032_v17 }
 0x17b   : > { %4966 = vmatmul.mubr.msk.f32.vlgmr.msra.gmra.mrb[112].mxu1 %vm1584_vm2, %v6032_v17  ;;  %2357 = vmatprep.mubr.f32.mxu0 %v5519_v0 }
 0x17c   : > { %2470 = vmatprep.mubr.f32.mxu1 %v5519_v0 }
 0x17e   : > { %4959 = vmatmul.mubr.msk.f32.gmra.mrb[114].mxu0 %vm1584_vm2, %v6044_v39 }
 0x17f   : > { %4967 = vmatmul.mubr.msk.f32.gmra.mrb[114].mxu1 %vm1584_vm2, %v6044_v39  ;;  %2363 = vmatprep.mubr.f32.mxu0 %v5519_v0 }
 0x180   : > { %2476 = vmatprep.mubr.f32.mxu1 %v5519_v0 }
 0x182   : > { %4960 = vmatmul.mubr.msk.f32.gmra.mrb[116].mxu0 %vm1584_vm2, %v6060_v59 }
 0x183   : > { %4968 = vmatmul.mubr.msk.f32.gmra.mrb[116].mxu1 %vm1584_vm2, %v6060_v59  ;;  %2369 = vmatprep.mubr.f32.mxu0 %v5519_v0 }
 0x184   : > { %2482 = vmatprep.mubr.f32.mxu1 %v5519_v0 }
 0x186   : > { %4961 = vmatmul.mubr.msk.f32.gmra.mrb[118].mxu0 %vm1584_vm2, %v6074_v20 }
 0x187   : > { %4969 = vmatmul.mubr.msk.f32.gmra.mrb[118].mxu1 %vm1584_vm2, %v6074_v20  ;;  %2375 = vmatprep.mubr.f32.mxu0 %v5519_v0 }
 0x188   : > { %2488 = vmatprep.mubr.f32.mxu1 %v5519_v0 }
 0x18a   : > { %4962 = vmatmul.mubr.msk.f32.gmra.mrb[120].mxu0 %vm1584_vm2, %v6090_v36 }
 0x18b   : > { %4970 = vmatmul.mubr.msk.f32.gmra.mrb[120].mxu1 %vm1584_vm2, %v6090_v36  ;;  %2381 = vmatprep.mubr.f32.mxu0 %v5519_v0  ;;  %v6351_v36 = vpop.permute.xlu0 %1546 }
 0x18c   : > { %2494 = vmatprep.mubr.f32.mxu1 %v5519_v0 }
 0x18e   : > { %4963 = vmatmul.mubr.msk.f32.gmra.mrb[122].mxu0 %vm1584_vm2, %v6104_v62 }
 0x18f   : > { %4971 = vmatmul.mubr.msk.f32.gmra.mrb[122].mxu1 %vm1584_vm2, %v6104_v62  ;;  %2387 = vmatprep.mubr.f32.mxu0 %v5519_v0  ;;  %v6353_v62 = vpop.permute.xlu1 %1551  ;;  %v6363_v35 = vpop.permute.xlu0 %1556 }
 0x190   : > { %2500 = vmatprep.mubr.f32.mxu1 %v5519_v0 }
 0x192   : > { %4964 = vmatmul.mubr.msk.f32.gmra.mrb[124].mxu0 %vm1584_vm2, %v6120_v16 }
 0x193   : > { %4972 = vmatmul.mubr.msk.f32.gmra.mrb[124].mxu1 %vm1584_vm2, %v6120_v16  ;;  %2393 = vmatprep.mubr.f32.mxu0 %v5519_v0  ;;  %v6365_v40 = vpop.permute.xlu1 %1561 }
 0x194   : > { %2506 = vmatprep.mubr.f32.mxu1 %v5519_v0 }
 0x196   : > { %4965 = vmatmul.mubr.msk.f32.gmra.mrb[126].mxu0 %vm1584_vm2, %v6134_v45 }
 0x197   : > { %4973 = vmatmul.mubr.msk.f32.gmra.mrb[126].mxu1 %vm1584_vm2, %v6134_v45  ;;  %2715 = vmatprep.mubr.f32.mxu0 %v5519_v0 }
 0x198   : > { %2786 = vmatprep.mubr.f32.mxu1 %v5519_v0 }
 0x1ec   : > { %v1675_v17 = vpop.f32.mrb[64].mxu0  ;;  %v1788_v39 = vpop.f32.mrb[64].mxu1 }
 0x1ed   : > { %v1677_v59 = vpop.f32.mrb[65].mxu0  ;;  %v1790_v20 = vpop.f32.mrb[65].mxu1  ;;  %v1676_v16 = vadd.f32 %v1675_v17, %v6351_v36  ;;  %v1789_v3 = vadd.f32 %v1788_v39, %v6351_v36 }
 0x1ee   : > { %v1678_v4 = vadd.f32 %v1677_v59, %v6351_v36  ;;  %v1791_v45 = vadd.f32 %v1790_v20, %v6351_v36 }
 0x1ef   : > { %v2513_v15 = vmax.f32 %v1676_v16, 0.0  ;;  %v2515_v22 = vmax.f32 %v1789_v3, 0.0 }
 0x1f0   : > { %v1681_v5 = vpop.f32.mrb[66].mxu0  ;;  %v1794_v6 = vpop.f32.mrb[66].mxu1  ;;  %v2514_v25 = vmax.f32 %v1678_v4, 0.0  ;;  %v2516_v26 = vmax.f32 %v1791_v45, 0.0 }
 0x1f1   : > { %v1682_v7 = vadd.f32 %v1681_v5, %v6353_v62  ;;  %v1795_v8 = vadd.f32 %v1794_v6, %v6353_v62  ;;  %v1683_v53 = vpop.f32.mrb[67].mxu0  ;;  %v1796_v48 = vpop.f32.mrb[67].mxu1 }
 0x1f2   : > { %v1684_v11 = vadd.f32 %v1683_v53, %v6353_v62  ;;  %v1797_v12 = vadd.f32 %v1796_v48, %v6353_v62  ;;  %v6375_v45 = vpop.permute.xlu0 %1566 }
 0x1f3   : > { %v2529_v23 = vmax.f32 %v1682_v7, 0.0  ;;  %v2531_v24 = vmax.f32 %v1795_v8, 0.0  ;;  %v6377_v7 = vpop.permute.xlu1 %1571 }
 0x1f4   : > { %v2530_v28 = vmax.f32 %v1684_v11, 0.0  ;;  %v2532_v29 = vmax.f32 %v1797_v12, 0.0  ;;  %v1687_v31 = vpop.f32.mrb[68].mxu0  ;;  %v1800_v56 = vpop.f32.mrb[68].mxu1 }
 0x1f5   : > { %v5205_v32 = vpack.c.bf16 %v2529_v23, %v2513_v15  ;;  %v5221_v33 = vpack.c.bf16 %v2531_v24, %v2515_v22  ;;  %v1689_v34 = vpop.f32.mrb[69].mxu0  ;;  %v1802_v49 = vpop.f32.mrb[69].mxu1  ;;  %v1688_v44 = vadd.f32 %v1687_v31, %v6363_v35  ;;  %v1801_v46 = vadd.f32 %v1800_v56, %v6363_v35 }
 0x1f6   : > { %v5203_v37 = vpack.c.bf16 %v2530_v28, %v2514_v25  ;;  %v5219_v38 = vpack.c.bf16 %v2532_v29, %v2516_v26  ;;  %v1690_v47 = vadd.f32 %v1689_v34, %v6363_v35  ;;  %v1803_v50 = vadd.f32 %v1802_v49, %v6363_v35 }
 0x1f7   : > { %v2545_v58 = vmax.f32 %v1688_v44, 0.0  ;;  %v2547_v60 = vmax.f32 %v1801_v46, 0.0 }
 0x1f8   : > { %v1693_v51 = vpop.f32.mrb[70].mxu0  ;;  %v1806_v52 = vpop.f32.mrb[70].mxu1  ;;  %5204 = vmatprep.subr.bf16.mxu0 %v5203_v37  ;;  %5220 = vmatprep.subr.bf16.mxu1 %v5219_v38  ;;  %v2546_v1 = vmax.f32 %v1690_v47, 0.0  ;;  %v2548_v2 = vmax.f32 %v1803_v50, 0.0 }
 0x1f9   : > { %v1694_v27 = vadd.f32 %v1693_v51, %v6365_v40  ;;  %v1807_v54 = vadd.f32 %v1806_v52, %v6365_v40  ;;  %v1695_v55 = vpop.f32.mrb[71].mxu0  ;;  %v1808_v21 = vpop.f32.mrb[71].mxu1  ;;  %5206 = vmatpush1.bf16.msra.mxu0 %v5205_v32  ;;  %5222 = vmatpush1.bf16.msra.mxu1 %v5221_v33 }
 0x1fa   : > { %v1696_v57 = vadd.f32 %v1695_v55, %v6365_v40  ;;  %v1809_v43 = vadd.f32 %v1808_v21, %v6365_v40  ;;  %v6387_v52 = vpop.permute.xlu0 %1576  ;;  %v6389_v55 = vpop.permute.xlu1 %1581 }
 0x1fb   : > { %v2561_v61 = vmax.f32 %v1694_v27, 0.0  ;;  %v2563_v63 = vmax.f32 %v1807_v54, 0.0 }
 0x1fc   : > { %v2562_v30 = vmax.f32 %v1696_v57, 0.0  ;;  %v2564_v17 = vmax.f32 %v1809_v43, 0.0  ;;  %v1699_v39 = vpop.f32.mrb[72].mxu0  ;;  %v1812_v59 = vpop.f32.mrb[72].mxu1 }
 0x1fd   : > { %v5209_v20 = vpack.c.bf16 %v2561_v61, %v2545_v58  ;;  %v5225_v16 = vpack.c.bf16 %v2563_v63, %v2547_v60  ;;  %v1701_v3 = vpop.f32.mrb[73].mxu0  ;;  %v1814_v4 = vpop.f32.mrb[73].mxu1  ;;  %v1700_v8 = vadd.f32 %v1699_v39, %v6375_v45  ;;  %v1813_v53 = vadd.f32 %v1812_v59, %v6375_v45 }
 0x1fe   : > { %v5207_v5 = vpack.c.bf16 %v2562_v30, %v2546_v1  ;;  %v5223_v6 = vpack.c.bf16 %v2564_v17, %v2548_v2  ;;  %v1702_v48 = vadd.f32 %v1701_v3, %v6375_v45  ;;  %v1815_v11 = vadd.f32 %v1814_v4, %v6375_v45 }
 0x1ff   : > { %v2577_v29 = vmax.f32 %v1700_v8, 0.0  ;;  %v2579_v31 = vmax.f32 %v1813_v53, 0.0 }
 0x200   : > { %v1705_v12 = vpop.f32.mrb[74].mxu0  ;;  %v1818_v15 = vpop.f32.mrb[74].mxu1  ;;  %5208 = vmatprep.subr.bf16.mxu0 %v5207_v5  ;;  %5224 = vmatprep.subr.bf16.mxu1 %v5223_v6  ;;  %v2578_v33 = vmax.f32 %v1702_v48, 0.0  ;;  %v2580_v34 = vmax.f32 %v1815_v11, 0.0 }
 0x201   : > { %v1706_v22 = vadd.f32 %v1705_v12, %v6377_v7  ;;  %v1819_v23 = vadd.f32 %v1818_v15, %v6377_v7  ;;  %v1707_v24 = vpop.f32.mrb[75].mxu0  ;;  %v1820_v25 = vpop.f32.mrb[75].mxu1  ;;  %5210 = vmatpush1.bf16.msra.mxu0 %v5209_v20  ;;  %5226 = vmatpush1.bf16.msra.mxu1 %v5225_v16 }
 0x202   : > { %v1708_v26 = vadd.f32 %v1707_v24, %v6377_v7  ;;  %v1821_v28 = vadd.f32 %v1820_v25, %v6377_v7 }
 0x203   : > { %v2593_v56 = vmax.f32 %v1706_v22, 0.0  ;;  %v2595_v32 = vmax.f32 %v1819_v23, 0.0 }
 0x204   : > { %v2594_v49 = vmax.f32 %v1708_v26, 0.0  ;;  %v2596_v37 = vmax.f32 %v1821_v28, 0.0  ;;  %v1711_v38 = vpop.f32.mrb[76].mxu0  ;;  %v1824_v44 = vpop.f32.mrb[76].mxu1 }
 0x205   : > { %v5213_v46 = vpack.c.bf16 %v2593_v56, %v2577_v29  ;;  %v5229_v47 = vpack.c.bf16 %v2595_v32, %v2579_v31  ;;  %v1713_v50 = vpop.f32.mrb[77].mxu0  ;;  %v1826_v51 = vpop.f32.mrb[77].mxu1  ;;  %v1712_v21 = vadd.f32 %v1711_v38, %v6387_v52  ;;  %v1825_v57 = vadd.f32 %v1824_v44, %v6387_v52  ;;  %v6405_v31 = vld [vmem:[%s6927_s5] sm:$0xff] }
 0x206   : > { %v5211_v27 = vpack.c.bf16 %v2594_v49, %v2578_v33  ;;  %v5227_v54 = vpack.c.bf16 %v2596_v37, %v2580_v34  ;;  %v1714_v43 = vadd.f32 %v1713_v50, %v6387_v52  ;;  %v1827_v58 = vadd.f32 %v1826_v51, %v6387_v52 }
 0x207   : > { %v2609_v59 = vmax.f32 %v1712_v21, 0.0  ;;  %v2611_v20 = vmax.f32 %v1825_v57, 0.0 }
 0x208   : > { %v1717_v60 = vpop.f32.mrb[78].mxu0  ;;  %v1830_v61 = vpop.f32.mrb[78].mxu1  ;;  %5212 = vmatprep.subr.bf16.mxu0 %v5211_v27  ;;  %5228 = vmatprep.subr.bf16.mxu1 %v5227_v54  ;;  %v2610_v4 = vmax.f32 %v1714_v43, 0.0  ;;  %v2612_v5 = vmax.f32 %v1827_v58, 0.0 }
 0x209   : > { %v1718_v63 = vadd.f32 %v1717_v60, %v6389_v55  ;;  %v1831_v1 = vadd.f32 %v1830_v61, %v6389_v55  ;;  %v1719_v2 = vpop.f32.mrb[79].mxu0  ;;  %v1832_v30 = vpop.f32.mrb[79].mxu1  ;;  %5214 = vmatpush1.bf16.msra.mxu0 %v5213_v46  ;;  %5230 = vmatpush1.bf16.msra.mxu1 %v5229_v47 }
 0x20a   : > { %v1720_v17 = vadd.f32 %v1719_v2, %v6389_v55  ;;  %v1833_v39 = vadd.f32 %v1832_v30, %v6389_v55 }
 0x20b   : > { %v2625_v16 = vmax.f32 %v1718_v63, 0.0  ;;  %v2627_v3 = vmax.f32 %v1831_v1, 0.0 }
 0x20c   : > { %v2626_v6 = vmax.f32 %v1720_v17, 0.0  ;;  %v2628_v8 = vmax.f32 %v1833_v39, 0.0 }
 0x20d   : > { %v5217_v53 = vpack.c.bf16 %v2625_v16, %v2609_v59  ;;  %v5233_v48 = vpack.c.bf16 %v2627_v3, %v2611_v20  ;;  %v1901_v11 = vpop.f32.mrb[80].mxu0  ;;  %v2014_v22 = vpop.f32.mrb[80].mxu1 }
 0x20e   : > { %v5215_v12 = vpack.c.bf16 %v2626_v6, %v2610_v4  ;;  %v5231_v15 = vpack.c.bf16 %v2628_v8, %v2612_v5  ;;  %v1903_v23 = vpop.f32.mrb[81].mxu0  ;;  %v2016_v24 = vpop.f32.mrb[81].mxu1  ;;  %v1902_v25 = vadd.f32 %v1901_v11, %v6351_v36  ;;  %v2015_v26 = vadd.f32 %v2014_v22, %v6351_v36 }
 0x20f   : > { %v1904_v28 = vadd.f32 %v1903_v23, %v6351_v36  ;;  %v2017_v56 = vadd.f32 %v2016_v24, %v6351_v36 }
 0x210   : > { %5216 = vmatprep.subr.bf16.mxu0 %v5215_v12  ;;  %5232 = vmatprep.subr.bf16.mxu1 %v5231_v15  ;;  %v2517_v44 = vmax.f32 %v1902_v25, 0.0  ;;  %v2519_v50 = vmax.f32 %v2015_v26, 0.0 }
 0x211   : > { %v1907_v29 = vpop.f32.mrb[82].mxu0  ;;  %5218 = vmatpush1.bf16.msra.mxu0 %v5217_v53  ;;  %5234 = vmatpush1.bf16.msra.mxu1 %v5233_v48  ;;  %v2518_v51 = vmax.f32 %v1904_v28, 0.0  ;;  %v2520_v57 = vmax.f32 %v2017_v56, 0.0 }
 0x212   : > { %v1908_v32 = vadd.f32 %v1907_v29, %v6353_v62  ;;  %v2020_v33 = vpop.f32.mrb[82].mxu1  ;;  %v1909_v34 = vpop.f32.mrb[83].mxu0 }
 0x213   : > { %v2021_v49 = vadd.f32 %v2020_v33, %v6353_v62  ;;  %v1910_v37 = vadd.f32 %v1909_v34, %v6353_v62  ;;  %v2022_v38 = vpop.f32.mrb[83].mxu1 }
 0x214   : > { %v2533_v46 = vmax.f32 %v1908_v32, 0.0  ;;  %v2023_v47 = vadd.f32 %v2022_v38, %v6353_v62  ;;  %4974 = vmatmul.mubr.msk.f32.vlgmr.msra.gmra.mrb[128].mxu0 %vm1584_vm2, %v6405_v31  ;;  %4975 = vmatmul.mubr.msk.f32.vlgmr.msra.gmra.mrb[128].mxu1 %vm1584_vm2, %v6405_v31 }
 0x215   : > { %v2535_v27 = vmax.f32 %v2021_v49, 0.0  ;;  %v2534_v54 = vmax.f32 %v1910_v37, 0.0  ;;  %v1913_v21 = vpop.f32.mrb[84].mxu0  ;;  %2857 = vmatprep.mubr.f32.mxu0 %v5519_v0  ;;  %2928 = vmatprep.mubr.f32.mxu1 %v5519_v0 }
 0x216   : > { %v5237_v43 = vpack.c.bf16 %v2533_v46, %v2517_v44  ;;  %v2536_v58 = vmax.f32 %v2023_v47, 0.0  ;;  %v2026_v60 = vpop.f32.mrb[84].mxu1  ;;  %v1915_v61 = vpop.f32.mrb[85].mxu0  ;;  %v1914_v17 = vadd.f32 %v1913_v21, %v6363_v35 }
 0x217   : > { %v5253_v63 = vpack.c.bf16 %v2535_v27, %v2519_v50  ;;  %v5235_v1 = vpack.c.bf16 %v2534_v54, %v2518_v51  ;;  %v2028_v2 = vpop.f32.mrb[85].mxu1  ;;  %v2027_v39 = vadd.f32 %v2026_v60, %v6363_v35  ;;  %v1916_v59 = vadd.f32 %v1915_v61, %v6363_v35 }
 0x218   : > { %v5251_v30 = vpack.c.bf16 %v2536_v58, %v2520_v57  ;;  %v2029_v16 = vadd.f32 %v2028_v2, %v6363_v35  ;;  %v2549_v48 = vmax.f32 %v1914_v17, 0.0 }
 0x219   : > { %v1919_v20 = vpop.f32.mrb[86].mxu0  ;;  %5236 = vmatprep.subr.bf16.mxu0 %v5235_v1  ;;  %v2551_v15 = vmax.f32 %v2027_v39, 0.0  ;;  %v2550_v22 = vmax.f32 %v1916_v59, 0.0 }
 0x21a   : > { %v1920_v3 = vadd.f32 %v1919_v20, %v6365_v40  ;;  %v2032_v4 = vpop.f32.mrb[86].mxu1  ;;  %5252 = vmatprep.subr.bf16.mxu1 %v5251_v30  ;;  %v1921_v5 = vpop.f32.mrb[87].mxu0  ;;  %5238 = vmatpush1.bf16.msra.mxu0 %v5237_v43  ;;  %v2552_v26 = vmax.f32 %v2029_v16, 0.0 }
 0x21b   : > { %v2033_v6 = vadd.f32 %v2032_v4, %v6365_v40  ;;  %v1922_v8 = vadd.f32 %v1921_v5, %v6365_v40  ;;  %v2034_v53 = vpop.f32.mrb[87].mxu1  ;;  %5254 = vmatpush1.bf16.msra.mxu1 %v5253_v63 }
 0x21c   : > { %v2565_v11 = vmax.f32 %v1920_v3, 0.0  ;;  %v2035_v12 = vadd.f32 %v2034_v53, %v6365_v40 }
 0x21d   : > { %v2567_v23 = vmax.f32 %v2033_v6, 0.0  ;;  %v2566_v24 = vmax.f32 %v1922_v8, 0.0  ;;  %v1925_v25 = vpop.f32.mrb[88].mxu0 }
 0x21e   : > { %v5241_v28 = vpack.c.bf16 %v2565_v11, %v2549_v48  ;;  %v2568_v29 = vmax.f32 %v2035_v12, 0.0  ;;  %v2038_v56 = vpop.f32.mrb[88].mxu1  ;;  %v1927_v32 = vpop.f32.mrb[89].mxu0  ;;  %v1926_v38 = vadd.f32 %v1925_v25, %v6375_v45 }
 0x21f   : > { %v5257_v33 = vpack.c.bf16 %v2567_v23, %v2551_v15  ;;  %v5239_v34 = vpack.c.bf16 %v2566_v24, %v2550_v22  ;;  %v2040_v49 = vpop.f32.mrb[89].mxu1  ;;  %v2039_v44 = vadd.f32 %v2038_v56, %v6375_v45  ;;  %v1928_v46 = vadd.f32 %v1927_v32, %v6375_v45 }
 0x220   : > { %v5255_v37 = vpack.c.bf16 %v2568_v29, %v2552_v26  ;;  %v2041_v50 = vadd.f32 %v2040_v49, %v6375_v45  ;;  %v2581_v58 = vmax.f32 %v1926_v38, 0.0 }
 0x221   : > { %v1931_v47 = vpop.f32.mrb[90].mxu0  ;;  %5240 = vmatprep.subr.bf16.mxu0 %v5239_v34  ;;  %v2583_v63 = vmax.f32 %v2039_v44, 0.0  ;;  %v2582_v1 = vmax.f32 %v1928_v46, 0.0 }
 0x222   : > { %v1932_v51 = vadd.f32 %v1931_v47, %v6377_v7  ;;  %v2044_v27 = vpop.f32.mrb[90].mxu1  ;;  %5256 = vmatprep.subr.bf16.mxu1 %v5255_v37  ;;  %v1933_v54 = vpop.f32.mrb[91].mxu0  ;;  %5242 = vmatpush1.bf16.msra.mxu0 %v5241_v28  ;;  %v2584_v39 = vmax.f32 %v2041_v50, 0.0 }
 0x223   : > { %v2045_v21 = vadd.f32 %v2044_v27, %v6377_v7  ;;  %v1934_v57 = vadd.f32 %v1933_v54, %v6377_v7  ;;  %v2046_v43 = vpop.f32.mrb[91].mxu1  ;;  %5258 = vmatpush1.bf16.msra.mxu1 %v5257_v33 }
 0x224   : > { %v2597_v60 = vmax.f32 %v1932_v51, 0.0  ;;  %v2047_v61 = vadd.f32 %v2046_v43, %v6377_v7 }
 0x225   : > { %v2599_v2 = vmax.f32 %v2045_v21, 0.0  ;;  %v2598_v30 = vmax.f32 %v1934_v57, 0.0  ;;  %v1937_v17 = vpop.f32.mrb[92].mxu0 }
 0x226   : > { %v5245_v59 = vpack.c.bf16 %v2597_v60, %v2581_v58  ;;  %v2600_v20 = vmax.f32 %v2047_v61, 0.0  ;;  %v2050_v16 = vpop.f32.mrb[92].mxu1  ;;  %v1939_v3 = vpop.f32.mrb[93].mxu0  ;;  %v1938_v53 = vadd.f32 %v1937_v17, %v6387_v52 }
 0x227   : > { %v5261_v4 = vpack.c.bf16 %v2599_v2, %v2583_v63  ;;  %v5243_v5 = vpack.c.bf16 %v2598_v30, %v2582_v1  ;;  %v2052_v6 = vpop.f32.mrb[93].mxu1  ;;  %v2051_v48 = vadd.f32 %v2050_v16, %v6387_v52  ;;  %v1940_v11 = vadd.f32 %v1939_v3, %v6387_v52 }
 0x228   : > { %v5259_v8 = vpack.c.bf16 %v2600_v20, %v2584_v39  ;;  %v2053_v15 = vadd.f32 %v2052_v6, %v6387_v52  ;;  %v2613_v29 = vmax.f32 %v1938_v53, 0.0 }
 0x229   : > { %v1943_v12 = vpop.f32.mrb[94].mxu0  ;;  %5244 = vmatprep.subr.bf16.mxu0 %v5243_v5  ;;  %v2615_v33 = vmax.f32 %v2051_v48, 0.0  ;;  %v2614_v34 = vmax.f32 %v1940_v11, 0.0 }
 0x22a   : > { %v1944_v22 = vadd.f32 %v1943_v12, %v6389_v55  ;;  %v2056_v23 = vpop.f32.mrb[94].mxu1  ;;  %5260 = vmatprep.subr.bf16.mxu1 %v5259_v8  ;;  %v1945_v24 = vpop.f32.mrb[95].mxu0  ;;  %5246 = vmatpush1.bf16.msra.mxu0 %v5245_v59  ;;  %v2616_v44 = vmax.f32 %v2053_v15, 0.0 }
 0x22b   : > { %v2057_v25 = vadd.f32 %v2056_v23, %v6389_v55  ;;  %v1946_v26 = vadd.f32 %v1945_v24, %v6389_v55  ;;  %v2058_v28 = vpop.f32.mrb[95].mxu1  ;;  %5262 = vmatpush1.bf16.msra.mxu1 %v5261_v4 }
 0x22c   : > { %v2629_v56 = vmax.f32 %v1944_v22, 0.0  ;;  %v2059_v32 = vadd.f32 %v2058_v28, %v6389_v55 }
 0x22d   : > { %v2631_v49 = vmax.f32 %v2057_v25, 0.0  ;;  %v2630_v37 = vmax.f32 %v1946_v26, 0.0  ;;  %v2127_v38 = vpop.f32.mrb[96].mxu0 }
 0x22e   : > { %v5249_v46 = vpack.c.bf16 %v2629_v56, %v2613_v29  ;;  %v2632_v47 = vmax.f32 %v2059_v32, 0.0  ;;  %v2240_v50 = vpop.f32.mrb[96].mxu1  ;;  %v2129_v51 = vpop.f32.mrb[97].mxu0  ;;  %v2128_v43 = vadd.f32 %v2127_v38, %v6351_v36 }
 0x22f   : > { %v5265_v27 = vpack.c.bf16 %v2631_v49, %v2615_v33  ;;  %v5247_v54 = vpack.c.bf16 %v2630_v37, %v2614_v34  ;;  %v2242_v21 = vpop.f32.mrb[97].mxu1  ;;  %v2241_v58 = vadd.f32 %v2240_v50, %v6351_v36  ;;  %v2130_v60 = vadd.f32 %v2129_v51, %v6351_v36 }
 0x230   : > { %v5263_v57 = vpack.c.bf16 %v2632_v47, %v2616_v44  ;;  %v2243_v63 = vadd.f32 %v2242_v21, %v6351_v36  ;;  %v2521_v20 = vmax.f32 %v2128_v43, 0.0 }
 0x231   : > { %v2133_v61 = vpop.f32.mrb[98].mxu0  ;;  %5248 = vmatprep.subr.bf16.mxu0 %v5247_v54  ;;  %v2523_v4 = vmax.f32 %v2241_v58, 0.0  ;;  %v2522_v5 = vmax.f32 %v2130_v60, 0.0 }
 0x232   : > { %v2134_v1 = vadd.f32 %v2133_v61, %v6353_v62  ;;  %v2246_v2 = vpop.f32.mrb[98].mxu1  ;;  %5264 = vmatprep.subr.bf16.mxu1 %v5263_v57  ;;  %v2135_v30 = vpop.f32.mrb[99].mxu0  ;;  %5250 = vmatpush1.bf16.msra.mxu0 %v5249_v46  ;;  %v2524_v48 = vmax.f32 %v2243_v63, 0.0 }
 0x233   : > { %v2247_v17 = vadd.f32 %v2246_v2, %v6353_v62  ;;  %v2136_v39 = vadd.f32 %v2135_v30, %v6353_v62  ;;  %v2248_v59 = vpop.f32.mrb[99].mxu1  ;;  %5266 = vmatpush1.bf16.msra.mxu1 %v5265_v27 }
 0x234   : > { %v2537_v16 = vmax.f32 %v2134_v1, 0.0  ;;  %v2249_v3 = vadd.f32 %v2248_v59, %v6353_v62 }
 0x235   : > { %v2539_v6 = vmax.f32 %v2247_v17, 0.0  ;;  %v2538_v8 = vmax.f32 %v2136_v39, 0.0  ;;  %v2139_v53 = vpop.f32.mrb[100].mxu0  ;;  %4976 = vmatmul.mubr.msk.f32.vlgmr.msra.gmra.mrb[130].mxu0 %vm1584_vm2, %v6405_v31 }
 0x236   : > { %v5269_v11 = vpack.c.bf16 %v2537_v16, %v2521_v20  ;;  %v2540_v12 = vmax.f32 %v2249_v3, 0.0  ;;  %v2252_v15 = vpop.f32.mrb[100].mxu1  ;;  %4977 = vmatmul.mubr.msk.f32.vlgmr.msra.gmra.mrb[130].mxu1 %vm1584_vm2, %v6405_v31  ;;  %v2141_v22 = vpop.f32.mrb[101].mxu0  ;;  %2999 = vmatprep.mubr.f32.mxu0 %v5519_v0  ;;  %v2140_v28 = vadd.f32 %v2139_v53, %v6363_v35 }
 0x237   : > { %v5285_v23 = vpack.c.bf16 %v2539_v6, %v2523_v4  ;;  %v5267_v24 = vpack.c.bf16 %v2538_v8, %v2522_v5  ;;  %v2254_v25 = vpop.f32.mrb[101].mxu1  ;;  %3070 = vmatprep.mubr.f32.mxu1 %v5519_v0  ;;  %v2253_v29 = vadd.f32 %v2252_v15, %v6363_v35  ;;  %v2142_v56 = vadd.f32 %v2141_v22, %v6363_v35 }
 0x238   : > { %v5283_v26 = vpack.c.bf16 %v2540_v12, %v2524_v48  ;;  %v2255_v33 = vadd.f32 %v2254_v25, %v6363_v35  ;;  %v2553_v47 = vmax.f32 %v2140_v28, 0.0 }
 0x239   : > { %v2145_v32 = vpop.f32.mrb[102].mxu0  ;;  %5268 = vmatprep.subr.bf16.mxu0 %v5267_v24  ;;  %v2555_v27 = vmax.f32 %v2253_v29, 0.0  ;;  %v2554_v54 = vmax.f32 %v2142_v56, 0.0 }
 0x23a   : > { %v2146_v34 = vadd.f32 %v2145_v32, %v6365_v40  ;;  %v2258_v49 = vpop.f32.mrb[102].mxu1  ;;  %5284 = vmatprep.subr.bf16.mxu1 %v5283_v26  ;;  %v2147_v37 = vpop.f32.mrb[103].mxu0  ;;  %5270 = vmatpush1.bf16.msra.mxu0 %v5269_v11  ;;  %v2556_v58 = vmax.f32 %v2255_v33, 0.0 }
 0x23b   : > { %v2259_v38 = vadd.f32 %v2258_v49, %v6365_v40  ;;  %v2148_v44 = vadd.f32 %v2147_v37, %v6365_v40  ;;  %v2260_v46 = vpop.f32.mrb[103].mxu1  ;;  %5286 = vmatpush1.bf16.msra.mxu1 %v5285_v23 }
 0x23c   : > { %v2569_v50 = vmax.f32 %v2146_v34, 0.0  ;;  %v2261_v51 = vadd.f32 %v2260_v46, %v6365_v40 }
 0x23d   : > { %v2571_v21 = vmax.f32 %v2259_v38, 0.0  ;;  %v2570_v57 = vmax.f32 %v2148_v44, 0.0  ;;  %v2151_v43 = vpop.f32.mrb[104].mxu0 }
 0x23e   : > { %v5273_v60 = vpack.c.bf16 %v2569_v50, %v2553_v47  ;;  %v2572_v61 = vmax.f32 %v2261_v51, 0.0  ;;  %v2264_v63 = vpop.f32.mrb[104].mxu1  ;;  %v2153_v1 = vpop.f32.mrb[105].mxu0  ;;  %v2152_v59 = vadd.f32 %v2151_v43, %v6375_v45 }
 0x23f   : > { %v5289_v2 = vpack.c.bf16 %v2571_v21, %v2555_v27  ;;  %v5271_v30 = vpack.c.bf16 %v2570_v57, %v2554_v54  ;;  %v2266_v17 = vpop.f32.mrb[105].mxu1  ;;  %v2265_v20 = vadd.f32 %v2264_v63, %v6375_v45  ;;  %v2154_v16 = vadd.f32 %v2153_v1, %v6375_v45 }
 0x240   : > { %v5287_v39 = vpack.c.bf16 %v2572_v61, %v2556_v58  ;;  %v2267_v4 = vadd.f32 %v2266_v17, %v6375_v45  ;;  %v2585_v12 = vmax.f32 %v2152_v59, 0.0 }
 0x241   : > { %v2157_v3 = vpop.f32.mrb[106].mxu0  ;;  %5272 = vmatprep.subr.bf16.mxu0 %v5271_v30  ;;  %v2587_v23 = vmax.f32 %v2265_v20, 0.0  ;;  %v2586_v24 = vmax.f32 %v2154_v16, 0.0 }
 0x242   : > { %v2158_v5 = vadd.f32 %v2157_v3, %v6377_v7  ;;  %v2270_v6 = vpop.f32.mrb[106].mxu1  ;;  %5288 = vmatprep.subr.bf16.mxu1 %v5287_v39  ;;  %v2159_v8 = vpop.f32.mrb[107].mxu0  ;;  %5274 = vmatpush1.bf16.msra.mxu0 %v5273_v60  ;;  %v2588_v29 = vmax.f32 %v2267_v4, 0.0 }
 0x243   : > { %v2271_v53 = vadd.f32 %v2270_v6, %v6377_v7  ;;  %v2160_v48 = vadd.f32 %v2159_v8, %v6377_v7  ;;  %v2272_v11 = vpop.f32.mrb[107].mxu1  ;;  %5290 = vmatpush1.bf16.msra.mxu1 %v5289_v2 }
 0x244   : > { %v2601_v15 = vmax.f32 %v2158_v5, 0.0  ;;  %v2273_v22 = vadd.f32 %v2272_v11, %v6377_v7 }
 0x245   : > { %v2603_v25 = vmax.f32 %v2271_v53, 0.0  ;;  %v2602_v26 = vmax.f32 %v2160_v48, 0.0  ;;  %v2163_v28 = vpop.f32.mrb[108].mxu0 }
 0x246   : > { %v5277_v56 = vpack.c.bf16 %v2601_v15, %v2585_v12  ;;  %v2604_v32 = vmax.f32 %v2273_v22, 0.0  ;;  %v2276_v33 = vpop.f32.mrb[108].mxu1  ;;  %v2165_v34 = vpop.f32.mrb[109].mxu0  ;;  %v2164_v46 = vadd.f32 %v2163_v28, %v6387_v52 }
 0x247   : > { %v5293_v49 = vpack.c.bf16 %v2603_v25, %v2587_v23  ;;  %v5275_v37 = vpack.c.bf16 %v2602_v26, %v2586_v24  ;;  %v2278_v38 = vpop.f32.mrb[109].mxu1  ;;  %v2277_v47 = vadd.f32 %v2276_v33, %v6387_v52  ;;  %v2166_v50 = vadd.f32 %v2165_v34, %v6387_v52 }
 0x248   : > { %v5291_v44 = vpack.c.bf16 %v2604_v32, %v2588_v29  ;;  %v2279_v27 = vadd.f32 %v2278_v38, %v6387_v52  ;;  %v2617_v61 = vmax.f32 %v2164_v46, 0.0 }
 0x249   : > { %v2169_v51 = vpop.f32.mrb[110].mxu0  ;;  %5276 = vmatprep.subr.bf16.mxu0 %v5275_v37  ;;  %v2619_v2 = vmax.f32 %v2277_v47, 0.0  ;;  %v2618_v30 = vmax.f32 %v2166_v50, 0.0 }
 0x24a   : > { %v2170_v54 = vadd.f32 %v2169_v51, %v6389_v55  ;;  %v2282_v21 = vpop.f32.mrb[110].mxu1  ;;  %5292 = vmatprep.subr.bf16.mxu1 %v5291_v44  ;;  %v2171_v57 = vpop.f32.mrb[111].mxu0  ;;  %5278 = vmatpush1.bf16.msra.mxu0 %v5277_v56  ;;  %v2620_v20 = vmax.f32 %v2279_v27, 0.0 }
 0x24b   : > { %v2283_v43 = vadd.f32 %v2282_v21, %v6389_v55  ;;  %v2172_v58 = vadd.f32 %v2171_v57, %v6389_v55  ;;  %v2284_v60 = vpop.f32.mrb[111].mxu1  ;;  %5294 = vmatpush1.bf16.msra.mxu1 %v5293_v49 }
 0x24c   : > { %v2633_v63 = vmax.f32 %v2170_v54, 0.0  ;;  %v2285_v1 = vadd.f32 %v2284_v60, %v6389_v55 }
 0x24d   : > { %v2635_v17 = vmax.f32 %v2283_v43, 0.0  ;;  %v2634_v39 = vmax.f32 %v2172_v58, 0.0  ;;  %v2353_v59 = vpop.f32.mrb[112].mxu0 }
 0x24e   : > { %v5281_v16 = vpack.c.bf16 %v2633_v63, %v2617_v61  ;;  %v2636_v3 = vmax.f32 %v2285_v1, 0.0  ;;  %v2466_v4 = vpop.f32.mrb[112].mxu1  ;;  %v2355_v5 = vpop.f32.mrb[113].mxu0  ;;  %v2354_v11 = vadd.f32 %v2353_v59, %v6351_v36 }
 0x24f   : > { %v5297_v6 = vpack.c.bf16 %v2635_v17, %v2619_v2  ;;  %v5279_v8 = vpack.c.bf16 %v2634_v39, %v2618_v30  ;;  %v2468_v53 = vpop.f32.mrb[113].mxu1  ;;  %v2467_v12 = vadd.f32 %v2466_v4, %v6351_v36  ;;  %v2356_v15 = vadd.f32 %v2355_v5, %v6351_v36 }
 0x250   : > { %v5295_v48 = vpack.c.bf16 %v2636_v3, %v2620_v20  ;;  %v2469_v23 = vadd.f32 %v2468_v53, %v6351_v36  ;;  %v2525_v32 = vmax.f32 %v2354_v11, 0.0 }
 0x251   : > { %v2359_v22 = vpop.f32.mrb[114].mxu0  ;;  %5280 = vmatprep.subr.bf16.mxu0 %v5279_v8  ;;  %v2527_v49 = vmax.f32 %v2467_v12, 0.0  ;;  %v2526_v37 = vmax.f32 %v2356_v15, 0.0 }
 0x252   : > { %v2360_v24 = vadd.f32 %v2359_v22, %v6353_v62  ;;  %v2472_v25 = vpop.f32.mrb[114].mxu1  ;;  %5296 = vmatprep.subr.bf16.mxu1 %v5295_v48  ;;  %v2361_v26 = vpop.f32.mrb[115].mxu0  ;;  %5282 = vmatpush1.bf16.msra.mxu0 %v5281_v16  ;;  %v2528_v46 = vmax.f32 %v2469_v23, 0.0 }
 0x253   : > { %v2473_v28 = vadd.f32 %v2472_v25, %v6353_v62  ;;  %v2362_v29 = vadd.f32 %v2361_v26, %v6353_v62  ;;  %v2474_v56 = vpop.f32.mrb[115].mxu1  ;;  %5298 = vmatpush1.bf16.msra.mxu1 %v5297_v6 }
 0x254   : > { %v2541_v33 = vmax.f32 %v2360_v24, 0.0  ;;  %v2475_v34 = vadd.f32 %v2474_v56, %v6353_v62 }
 0x255   : > { %v2543_v38 = vmax.f32 %v2473_v28, 0.0  ;;  %v2542_v36 = vmax.f32 %v2362_v29, 0.0  ;;  %v2365_v44 = vpop.f32.mrb[116].mxu0  ;;  %4978 = vmatmul.mubr.msk.f32.vlgmr.msra.gmra.mrb[132].mxu0 %vm1584_vm2, %v6405_v31 }
 0x256   : > { %v5301_v47 = vpack.c.bf16 %v2541_v33, %v2525_v32  ;;  %v2544_v50 = vmax.f32 %v2475_v34, 0.0  ;;  %v2478_v51 = vpop.f32.mrb[116].mxu1  ;;  %4979 = vmatmul.mubr.msk.f32.vlgmr.msra.gmra.mrb[132].mxu1 %vm1584_vm2, %v6405_v31  ;;  %v2367_v27 = vpop.f32.mrb[117].mxu0  ;;  %3141 = vmatprep.mubr.f32.mxu0 %v5519_v0  ;;  %v2366_v43 = vadd.f32 %v2365_v44, %v6363_v35 }
 0x257   : > { %v5317_v54 = vpack.c.bf16 %v2543_v38, %v2527_v49  ;;  %v5299_v62 = vpack.c.bf16 %v2542_v36, %v2526_v37  ;;  %v2480_v21 = vpop.f32.mrb[117].mxu1  ;;  %3212 = vmatprep.mubr.f32.mxu1 %v5519_v0  ;;  %v2479_v58 = vadd.f32 %v2478_v51, %v6363_v35  ;;  %v2368_v60 = vadd.f32 %v2367_v27, %v6363_v35 }
 0x258   : > { %v5315_v57 = vpack.c.bf16 %v2544_v50, %v2528_v46  ;;  %v2481_v63 = vadd.f32 %v2480_v21, %v6363_v35  ;;  %v2557_v20 = vmax.f32 %v2366_v43, 0.0 }
 0x259   : > { %v2371_v61 = vpop.f32.mrb[118].mxu0  ;;  %5300 = vmatprep.subr.bf16.mxu0 %v5299_v62  ;;  %v2559_v4 = vmax.f32 %v2479_v58, 0.0  ;;  %v2558_v5 = vmax.f32 %v2368_v60, 0.0 }
 0x25a   : > { %v2372_v1 = vadd.f32 %v2371_v61, %v6365_v40  ;;  %v2484_v2 = vpop.f32.mrb[118].mxu1  ;;  %5316 = vmatprep.subr.bf16.mxu1 %v5315_v57  ;;  %v2373_v30 = vpop.f32.mrb[119].mxu0  ;;  %5302 = vmatpush1.bf16.msra.mxu0 %v5301_v47  ;;  %v2560_v53 = vmax.f32 %v2481_v63, 0.0 }
 0x25b   : > { %v2485_v17 = vadd.f32 %v2484_v2, %v6365_v40  ;;  %v2374_v39 = vadd.f32 %v2373_v30, %v6365_v40  ;;  %v2486_v59 = vpop.f32.mrb[119].mxu1  ;;  %5318 = vmatpush1.bf16.msra.mxu1 %v5317_v54 }
 0x25c   : > { %v2573_v16 = vmax.f32 %v2372_v1, 0.0  ;;  %v2487_v3 = vadd.f32 %v2486_v59, %v6365_v40 }
 0x25d   : > { %v2575_v6 = vmax.f32 %v2485_v17, 0.0  ;;  %v2574_v35 = vmax.f32 %v2374_v39, 0.0  ;;  %v2377_v8 = vpop.f32.mrb[120].mxu0 }
 0x25e   : > { %v5305_v48 = vpack.c.bf16 %v2573_v16, %v2557_v20  ;;  %v2576_v11 = vmax.f32 %v2487_v3, 0.0  ;;  %v2490_v12 = vpop.f32.mrb[120].mxu1  ;;  %v2379_v15 = vpop.f32.mrb[121].mxu0  ;;  %v2378_v26 = vadd.f32 %v2377_v8, %v6375_v45 }
 0x25f   : > { %v5321_v22 = vpack.c.bf16 %v2575_v6, %v2559_v4  ;;  %v5303_v23 = vpack.c.bf16 %v2574_v35, %v2558_v5  ;;  %v2492_v24 = vpop.f32.mrb[121].mxu1  ;;  %v2491_v28 = vadd.f32 %v2490_v12, %v6375_v45  ;;  %v2380_v40 = vadd.f32 %v2379_v15, %v6375_v45 }
 0x260   : > { %v5319_v25 = vpack.c.bf16 %v2576_v11, %v2560_v53  ;;  %v2493_v56 = vadd.f32 %v2492_v24, %v6375_v45  ;;  %v2589_v36 = vmax.f32 %v2378_v26, 0.0 }
 0x261   : > { %v2383_v29 = vpop.f32.mrb[122].mxu0  ;;  %5304 = vmatprep.subr.bf16.mxu0 %v5303_v23  ;;  %v2591_v47 = vmax.f32 %v2491_v28, 0.0  ;;  %v2590_v50 = vmax.f32 %v2380_v40, 0.0 }
 0x262   : > { %v2384_v32 = vadd.f32 %v2383_v29, %v6377_v7  ;;  %v2496_v33 = vpop.f32.mrb[122].mxu1  ;;  %5320 = vmatprep.subr.bf16.mxu1 %v5319_v25  ;;  %v2385_v34 = vpop.f32.mrb[123].mxu0  ;;  %5306 = vmatpush1.bf16.msra.mxu0 %v5305_v48  ;;  %v2592_v54 = vmax.f32 %v2493_v56, 0.0 }
 0x263   : > { %v2497_v49 = vadd.f32 %v2496_v33, %v6377_v7  ;;  %v2386_v37 = vadd.f32 %v2385_v34, %v6377_v7  ;;  %v2498_v38 = vpop.f32.mrb[123].mxu1  ;;  %5322 = vmatpush1.bf16.msra.mxu1 %v5321_v22  ;;  %v6544_v34 = vld [vmem:[%s6930_s8 + $0x8] sm:$0xff] }
 0x264   : > { %v2605_v44 = vmax.f32 %v2384_v32, 0.0  ;;  %v2499_v46 = vadd.f32 %v2498_v38, %v6377_v7 }
 0x265   : > { %v2607_v51 = vmax.f32 %v2497_v49, 0.0  ;;  %v2606_v45 = vmax.f32 %v2386_v37, 0.0  ;;  %v2389_v27 = vpop.f32.mrb[124].mxu0  ;;  %v6555_v49 = vld [vmem:[%s6930_s8 + $0x10] sm:$0xff]  ;;  %v6566_v37 = vld [vmem:[%s6930_s8 + $0x18] sm:$0x7f] }
 0x266   : > { %v5309_v62 = vpack.c.bf16 %v2605_v44, %v2589_v36  ;;  %v2608_v21 = vmax.f32 %v2499_v46, 0.0  ;;  %v2502_v57 = vpop.f32.mrb[124].mxu1  ;;  %v2391_v43 = vpop.f32.mrb[125].mxu0  ;;  %v2390_v1 = vadd.f32 %v2389_v27, %v6387_v52 }
 0x267   : > { %v5325_v58 = vpack.c.bf16 %v2607_v51, %v2591_v47  ;;  %v5307_v60 = vpack.c.bf16 %v2606_v45, %v2590_v50  ;;  %v2504_v61 = vpop.f32.mrb[125].mxu1  ;;  %v2503_v2 = vadd.f32 %v2502_v57, %v6387_v52  ;;  %v2392_v7 = vadd.f32 %v2391_v43, %v6387_v52 }
 0x268   : > { %v5323_v63 = vpack.c.bf16 %v2608_v21, %v2592_v54  ;;  %v2505_v17 = vadd.f32 %v2504_v61, %v6387_v52  ;;  %v2621_v5 = vmax.f32 %v2390_v1, 0.0 }
 0x269   : > { %v2395_v30 = vpop.f32.mrb[126].mxu0  ;;  %5308 = vmatprep.subr.bf16.mxu0 %v5307_v60  ;;  %v2623_v8 = vmax.f32 %v2503_v2, 0.0  ;;  %v2622_v53 = vmax.f32 %v2392_v7, 0.0 }
 0x26a   : > { %v2396_v39 = vadd.f32 %v2395_v30, %v6389_v55  ;;  %v2508_v59 = vpop.f32.mrb[126].mxu1  ;;  %5324 = vmatprep.subr.bf16.mxu1 %v5323_v63  ;;  %v2397_v20 = vpop.f32.mrb[127].mxu0  ;;  %5310 = vmatpush1.bf16.msra.mxu0 %v5309_v62  ;;  %v2624_v11 = vmax.f32 %v2505_v17, 0.0 }
 0x26b   : > { %v2509_v16 = vadd.f32 %v2508_v59, %v6389_v55  ;;  %v2398_v3 = vadd.f32 %v2397_v20, %v6389_v55  ;;  %v2510_v4 = vpop.f32.mrb[127].mxu1  ;;  %5326 = vmatpush1.bf16.msra.mxu1 %v5325_v58  ;;  %v5447_v59 = vld [vmem:[%s5641_s17] sm:$0x77]  ;;  %v5448_v20 = vld [vmem:[%s5641_s17 + $0x8] sm:$0x77] }
 0x26c   : > { %v2637_v6 = vmax.f32 %v2396_v39, 0.0  ;;  %v2511_v35 = vadd.f32 %v2510_v4, %v6389_v55  ;;  %v6524_v55 = vpop.permute.xlu0 %2645 }
 0x26d   : > { %v2639_v48 = vmax.f32 %v2509_v16, 0.0  ;;  %v2638_v52 = vmax.f32 %v2398_v3, 0.0  ;;  %v3221_v16 = vld [vmem:[%s6929_s7 + $0x10] sm:$0xff]  ;;  %v5452_v3 = vld [vmem:[%s5641_s17 + $0x28] sm:$0x77] }
 0x26e   : > { %v5313_v12 = vpack.c.bf16 %v2637_v6, %v2621_v5  ;;  %v2640_v15 = vmax.f32 %v2511_v35, 0.0 }
 0x26f   : > { %v5329_v22 = vpack.c.bf16 %v2639_v48, %v2623_v8  ;;  %v5311_v23 = vpack.c.bf16 %v2638_v52, %v2622_v53 }
 0x270   : > { %v5327_v24 = vpack.c.bf16 %v2640_v15, %v2624_v11 }
 0x271   : > { %5312 = vmatprep.subr.bf16.mxu0 %v5311_v23 }
 0x272   : > { %5328 = vmatprep.subr.bf16.mxu1 %v5327_v24  ;;  %5314 = vmatpush1.bf16.msra.mxu0 %v5313_v12 }
 0x273   : > { %5330 = vmatpush1.bf16.msra.mxu1 %v5329_v22 }
 0x275   : > { %4980 = vmatmul.mubr.msk.f32.vlgmr.msra.gmra.mrb[134].mxu0 %vm1584_vm2, %v6405_v31 }
 0x276   : > { %4981 = vmatmul.mubr.msk.f32.vlgmr.msra.gmra.mrb[134].mxu1 %vm1584_vm2, %v6405_v31  ;;  %3304 = vmatprep.mubr.f32.mxu0 %v5519_v0  ;;  %v6533_v31 = vld [vmem:[%s6930_s8] sm:$0xff] }
 0x277   : > { %3393 = vmatprep.mubr.f32.mxu1 %v5519_v0 }
 0x2e7   : > { %v2717_v25 = vpop.f32.mrb[128].mxu0  ;;  %v2788_v26 = vpop.f32.mrb[128].mxu1 }
 0x2e8   : > { %v2719_v28 = vpop.f32.mrb[129].mxu0  ;;  %v2790_v40 = vpop.f32.mrb[129].mxu1  ;;  %v2718_v32 = vadd.f32 %v2717_v25, %v6524_v55  ;;  %v2789_v33 = vadd.f32 %v2788_v26, %v6524_v55 }
 0x2e9   : > { %v2720_v29 = vadd.f32 %v2719_v28, %v6524_v55  ;;  %v2791_v56 = vadd.f32 %v2790_v40, %v6524_v55 }
 0x2eb   : > { %3240 = vmatprep.subr.mxu0 %v2720_v29  ;;  %3329 = vmatprep.subr.mxu1 %v2791_v56 }
 0x2ec   : > { %3241 = vmatpush1.msra.mxu0 %v2718_v32  ;;  %3330 = vmatpush1.msra.mxu1 %v2789_v33 }
 0x2ed   : > { %4982 = vmatmul.mubr.msk.f32.vlgmr.msra.gmra.mrb[136].mxu0 %vm3227_vm3, %v6533_v31  ;;  %4986 = vmatmul.mubr.msk.f32.vlgmr.msra.gmra.mrb[136].mxu1 %vm3227_vm3, %v6533_v31 }
 0x2ee   : > { %3310 = vmatprep.mubr.f32.mxu0 %v5519_v0  ;;  %3399 = vmatprep.mubr.f32.mxu1 %v5519_v0 }
 0x2f1   : > { %4983 = vmatmul.mubr.msk.f32.gmra.mrb[138].mxu0 %vm3227_vm3, %v6544_v34  ;;  %4987 = vmatmul.mubr.msk.f32.gmra.mrb[138].mxu1 %vm3227_vm3, %v6544_v34 }
 0x2f2   : > { %3316 = vmatprep.mubr.f32.mxu0 %v5519_v0  ;;  %3405 = vmatprep.mubr.f32.mxu1 %v5519_v0 }
 0x2f5   : > { %4984 = vmatmul.mubr.msk.f32.gmra.mrb[140].mxu0 %vm3227_vm3, %v6555_v49  ;;  %4988 = vmatmul.mubr.msk.f32.gmra.mrb[140].mxu1 %vm3227_vm3, %v6555_v49 }
 0x2f6   : > { %3322 = vmatprep.mubr.f32.mxu0 %v5519_v0  ;;  %3411 = vmatprep.mubr.f32.mxu1 %v5519_v0 }
 0x2f9   : > { %4985 = vmatmul.mubr.msk.f32.gmra.mrb[142].mxu0 %vm3227_vm3, %v6566_v37  ;;  %4989 = vmatmul.mubr.msk.f32.gmra.mrb[142].mxu1 %vm3227_vm3, %v6566_v37 }
 0x2fa   : > { %3482 = vmatprep.mubr.f32.mxu0 %v5519_v0  ;;  %3571 = vmatprep.mubr.f32.mxu1 %v5519_v0 }
 0x308   : > { %v2859_v38 = vpop.f32.mrb[130].mxu0 }
 0x309   : > { %v2930_v36 = vpop.f32.mrb[130].mxu1  ;;  %v2861_v44 = vpop.f32.mrb[131].mxu0  ;;  %v2860_v50 = vadd.f32 %v2859_v38, %v6524_v55 }
 0x30a   : > { %v2862_v46 = vadd.f32 %v2861_v44, %v6524_v55  ;;  %v2932_v47 = vpop.f32.mrb[131].mxu1  ;;  %v2931_v45 = vadd.f32 %v2930_v36, %v6524_v55 }
 0x30b   : > { %v2933_v51 = vadd.f32 %v2932_v47, %v6524_v55 }
 0x30c   : > { %3418 = vmatprep.subr.mxu0 %v2862_v46 }
 0x30d   : > { %3507 = vmatprep.subr.mxu1 %v2933_v51  ;;  %3419 = vmatpush1.msra.mxu0 %v2860_v50 }
 0x30e   : > { %3508 = vmatpush1.msra.mxu1 %v2931_v45  ;;  %4990 = vmatmul.mubr.msk.f32.vlgmr.msra.gmra.mrb[144].mxu0 %vm3227_vm3, %v6533_v31 }
 0x30f   : > { %4994 = vmatmul.mubr.msk.f32.vlgmr.msra.gmra.mrb[144].mxu1 %vm3227_vm3, %v6533_v31  ;;  %3488 = vmatprep.mubr.f32.mxu0 %v5519_v0 }
 0x310   : > { %3577 = vmatprep.mubr.f32.mxu1 %v5519_v0 }
 0x312   : > { %4991 = vmatmul.mubr.msk.f32.gmra.mrb[146].mxu0 %vm3227_vm3, %v6544_v34 }
 0x313   : > { %4995 = vmatmul.mubr.msk.f32.gmra.mrb[146].mxu1 %vm3227_vm3, %v6544_v34  ;;  %3494 = vmatprep.mubr.f32.mxu0 %v5519_v0 }
 0x314   : > { %3583 = vmatprep.mubr.f32.mxu1 %v5519_v0 }
 0x316   : > { %4992 = vmatmul.mubr.msk.f32.gmra.mrb[148].mxu0 %vm3227_vm3, %v6555_v49 }
 0x317   : > { %4996 = vmatmul.mubr.msk.f32.gmra.mrb[148].mxu1 %vm3227_vm3, %v6555_v49  ;;  %3500 = vmatprep.mubr.f32.mxu0 %v5519_v0 }
 0x318   : > { %3589 = vmatprep.mubr.f32.mxu1 %v5519_v0 }
 0x31a   : > { %4993 = vmatmul.mubr.msk.f32.gmra.mrb[150].mxu0 %vm3227_vm3, %v6566_v37 }
 0x31b   : > { %4997 = vmatmul.mubr.msk.f32.gmra.mrb[150].mxu1 %vm3227_vm3, %v6566_v37  ;;  %3660 = vmatprep.mubr.f32.mxu0 %v5519_v0 }
 0x31c   : > { %3749 = vmatprep.mubr.f32.mxu1 %v5519_v0 }
 0x328   : > { %v3001_v27 = vpop.f32.mrb[132].mxu0 }
 0x329   : > { %v3072_v54 = vpop.f32.mrb[132].mxu1  ;;  %v3003_v62 = vpop.f32.mrb[133].mxu0  ;;  %v3002_v43 = vadd.f32 %v3001_v27, %v6524_v55 }
 0x32a   : > { %v3004_v21 = vadd.f32 %v3003_v62, %v6524_v55  ;;  %v3074_v57 = vpop.f32.mrb[133].mxu1  ;;  %v3073_v60 = vadd.f32 %v3072_v54, %v6524_v55 }
 0x32b   : > { %v3075_v58 = vadd.f32 %v3074_v57, %v6524_v55 }
 0x32c   : > { %3596 = vmatprep.subr.mxu0 %v3004_v21 }
 0x32d   : > { %3685 = vmatprep.subr.mxu1 %v3075_v58  ;;  %3597 = vmatpush1.msra.mxu0 %v3002_v43 }
 0x32e   : > { %3686 = vmatpush1.msra.mxu1 %v3073_v60  ;;  %4998 = vmatmul.mubr.msk.f32.vlgmr.msra.gmra.mrb[152].mxu0 %vm3227_vm3, %v6533_v31 }
 0x32f   : > { %5002 = vmatmul.mubr.msk.f32.vlgmr.msra.gmra.mrb[152].mxu1 %vm3227_vm3, %v6533_v31  ;;  %3666 = vmatprep.mubr.f32.mxu0 %v5519_v0 }
 0x330   : > { %3755 = vmatprep.mubr.f32.mxu1 %v5519_v0 }
 0x332   : > { %4999 = vmatmul.mubr.msk.f32.gmra.mrb[154].mxu0 %vm3227_vm3, %v6544_v34 }
 0x333   : > { %5003 = vmatmul.mubr.msk.f32.gmra.mrb[154].mxu1 %vm3227_vm3, %v6544_v34  ;;  %3672 = vmatprep.mubr.f32.mxu0 %v5519_v0 }
 0x334   : > { %3761 = vmatprep.mubr.f32.mxu1 %v5519_v0 }
 0x336   : > { %5000 = vmatmul.mubr.msk.f32.gmra.mrb[156].mxu0 %vm3227_vm3, %v6555_v49 }
 0x337   : > { %5004 = vmatmul.mubr.msk.f32.gmra.mrb[156].mxu1 %vm3227_vm3, %v6555_v49  ;;  %3678 = vmatprep.mubr.f32.mxu0 %v5519_v0 }
 0x338   : > { %3767 = vmatprep.mubr.f32.mxu1 %v5519_v0 }
 0x33a   : > { %5001 = vmatmul.mubr.msk.f32.gmra.mrb[158].mxu0 %vm3227_vm3, %v6566_v37 }
 0x33b   : > { %5005 = vmatmul.mubr.msk.f32.gmra.mrb[158].mxu1 %vm3227_vm3, %v6566_v37  ;;  %3838 = vmatprep.mubr.f32.mxu0 %v5519_v0 }
 0x33c   : > { %3927 = vmatprep.mubr.f32.mxu1 %v5519_v0 }
 0x348   : > { %v3143_v61 = vpop.f32.mrb[134].mxu0 }
 0x349   : > { %v3214_v63 = vpop.f32.mrb[134].mxu1  ;;  %v3145_v1 = vpop.f32.mrb[135].mxu0  ;;  %v3144_v30 = vadd.f32 %v3143_v61, %v6524_v55 }
 0x34a   : > { %v3146_v2 = vadd.f32 %v3145_v1, %v6524_v55  ;;  %v3216_v7 = vpop.f32.mrb[135].mxu1  ;;  %v3215_v39 = vadd.f32 %v3214_v63, %v6524_v55 }
 0x34b   : > { %v3217_v17 = vadd.f32 %v3216_v7, %v6524_v55 }
 0x34c   : > { %3774 = vmatprep.subr.mxu0 %v3146_v2 }
 0x34d   : > { %3863 = vmatprep.subr.mxu1 %v3217_v17  ;;  %3775 = vmatpush1.msra.mxu0 %v3144_v30 }
 0x34e   : > { %3864 = vmatpush1.msra.mxu1 %v3215_v39  ;;  %5006 = vmatmul.mubr.msk.f32.vlgmr.msra.gmra.mrb[160].mxu0 %vm3227_vm3, %v6533_v31 }
 0x34f   : > { %5010 = vmatmul.mubr.msk.f32.vlgmr.msra.gmra.mrb[160].mxu1 %vm3227_vm3, %v6533_v31  ;;  %3844 = vmatprep.mubr.f32.mxu0 %v5519_v0 }
 0x350   : > { %3933 = vmatprep.mubr.f32.mxu1 %v5519_v0  ;;  %5014 = vmatprep.subr.msk.mxu0 %vm463_vm0, %v5649_v9  ;;  %v6672_v9 = vld [vmem:[%s6929_s7] sm:$0xff] }
 0x351   : > { %5020 = vmatprep.subr.msk.mxu1 %vm463_vm0, %v5651_v10  ;;  %5015 = vmatpush1.msk.msra.mxu0 %vm463_vm0, %v5447_v59  ;;  %v6683_v10 = vld [vmem:[%s6929_s7 + $0x8] sm:$0xff] }
 0x352   : > { %5007 = vmatmul.mubr.msk.f32.gmra.mrb[162].mxu0 %vm3227_vm3, %v6544_v34  ;;  %5021 = vmatpush1.msk.msra.mxu1 %vm463_vm0, %v5448_v20 }
 0x353   : > { %5011 = vmatmul.mubr.msk.f32.gmra.mrb[162].mxu1 %vm3227_vm3, %v6544_v34  ;;  %3850 = vmatprep.mubr.f32.mxu0 %v5519_v0 }
 0x354   : > { %3939 = vmatprep.mubr.f32.mxu1 %v5519_v0  ;;  %5026 = vmatprep.subr.msk.mxu0 %vm463_vm0, %v5663_v13  ;;  %v5449_v13 = vld [vmem:[%s5641_s17 + $0x10] sm:$0x77] }
 0x355   : > { %5032 = vmatprep.subr.msk.mxu1 %vm463_vm0, %v5665_v14  ;;  %v5450_v14 = vld [vmem:[%s5641_s17 + $0x18] sm:$0x77] }
 0x356   : > { %5008 = vmatmul.mubr.msk.f32.gmra.mrb[164].mxu0 %vm3227_vm3, %v6555_v49 }
 0x357   : > { %5012 = vmatmul.mubr.msk.f32.gmra.mrb[164].mxu1 %vm3227_vm3, %v6555_v49  ;;  %3856 = vmatprep.mubr.f32.mxu0 %v5519_v0 }
 0x358   : > { %3945 = vmatprep.mubr.f32.mxu1 %v5519_v0 }
 0x35a   : > { %5009 = vmatmul.mubr.msk.f32.gmra.mrb[166].mxu0 %vm3227_vm3, %v6566_v37 }
 0x35b   : > { %5013 = vmatmul.mubr.msk.f32.gmra.mrb[166].mxu1 %vm3227_vm3, %v6566_v37  ;;  %4028 = vmatprep.mubr.f32.mxu0 %v5519_v0 }
 0x35c   : > { %4117 = vmatprep.mubr.f32.mxu1 %v5519_v0 }
 0x35e   : > { %5016 = vmatmul.mubr.msk.f32.vlgmr.msra.gmra.mrb[136].mxu0 %vm438_vm1, %v6672_v9 }
 0x35f   : > { %5022 = vmatmul.mubr.msk.f32.vlgmr.msra.gmra.mrb[136].mxu1 %vm438_vm1, %v6672_v9  ;;  %4034 = vmatprep.mubr.f32.mxu0 %v5519_v0 }
 0x360   : > { %4123 = vmatprep.mubr.f32.mxu1 %v5519_v0  ;;  %5027 = vmatpush1.msk.msra.mxu0 %vm463_vm0, %v5449_v13 }
 0x361   : > { %5033 = vmatpush1.msk.msra.mxu1 %vm463_vm0, %v5450_v14  ;;  %5038 = vmatprep.subr.msk.mxu0 %vm463_vm0, %v5692_v18  ;;  %v3222_v18 = vld [vmem:[%s6929_s7 + $0x18] sm:$0x7f] }
 0x362   : > { %5017 = vmatmul.mubr.msk.f32.gmra.mrb[138].mxu0 %vm438_vm1, %v6683_v10  ;;  %5044 = vmatprep.subr.msk.mxu1 %vm463_vm0, %v5696_v19  ;;  %v5451_v19 = vld [vmem:[%s5641_s17 + $0x20] sm:$0x77] }
 0x363   : > { %5023 = vmatmul.mubr.msk.f32.gmra.mrb[138].mxu1 %vm438_vm1, %v6683_v10  ;;  %4040 = vmatprep.mubr.f32.mxu0 %v5519_v0 }
 0x364   : > { %4129 = vmatprep.mubr.f32.mxu1 %v5519_v0 }
 0x366   : > { %5018 = vmatmul.mubr.msk.f32.gmra.mrb[140].mxu0 %vm438_vm1, %v3221_v16 }
 0x367   : > { %5024 = vmatmul.mubr.msk.f32.gmra.mrb[140].mxu1 %vm438_vm1, %v3221_v16  ;;  %4046 = vmatprep.mubr.f32.mxu0 %v5519_v0 }
 0x368   : > { %4135 = vmatprep.mubr.f32.mxu1 %v5519_v0 }
 0x36a   : > { %5019 = vmatmul.mubr.msk.f32.gmra.mrb[142].mxu0 %vm438_vm1, %v3222_v18 }
 0x36b   : > { %5025 = vmatmul.mubr.msk.f32.gmra.mrb[142].mxu1 %vm438_vm1, %v3222_v18  ;;  %4206 = vmatprep.mubr.f32.mxu0 %v5519_v0 }
 0x36c   : > { %4295 = vmatprep.mubr.f32.mxu1 %v5519_v0 }
 0x36e   : > { %5028 = vmatmul.mubr.msk.f32.vlgmr.msra.gmra.mrb[144].mxu0 %vm438_vm1, %v6672_v9 }
 0x36f   : > { %5034 = vmatmul.mubr.msk.f32.vlgmr.msra.gmra.mrb[144].mxu1 %vm438_vm1, %v6672_v9  ;;  %4212 = vmatprep.mubr.f32.mxu0 %v5519_v0 }
 0x370   : > { %4301 = vmatprep.mubr.f32.mxu1 %v5519_v0  ;;  %5039 = vmatpush1.msk.msra.mxu0 %vm463_vm0, %v5451_v19 }
 0x371   : > { %5045 = vmatpush1.msk.msra.mxu1 %vm463_vm0, %v5452_v3  ;;  %5050 = vmatprep.subr.msk.mxu0 %vm463_vm0, %v5817_v41  ;;  %v5453_v41 = vld [vmem:[%s5641_s17 + $0x30] sm:$0x77] }
 0x372   : > { %5029 = vmatmul.mubr.msk.f32.gmra.mrb[146].mxu0 %vm438_vm1, %v6683_v10  ;;  %5056 = vmatprep.subr.msk.mxu1 %vm463_vm0, %v5819_v42  ;;  %v5454_v42 = vld [vmem:[%s5641_s17 + $0x38] sm:$0x77]  ;;  %s336_s17 = sand.u32 1, %s5509_s10  }
 0x373   : > { %5035 = vmatmul.mubr.msk.f32.gmra.mrb[146].mxu1 %vm438_vm1, %v6683_v10  ;;  %4218 = vmatprep.mubr.f32.mxu0 %v5519_v0  ;;  %s4827_s14 = sshll.u32 %s336_s17, 9  ;;  %s6855_s23 = scalar_lea.sflag [#allocation3], %s336_s17 }
 0x374   : > { %4307 = vmatprep.mubr.f32.mxu1 %v5519_v0  ;;  %s6787_s16 = scalar_lea.vmem [#allocation2], %s4827_s14 }
 0x376   : > { %5030 = vmatmul.mubr.msk.f32.gmra.mrb[148].mxu0 %vm438_vm1, %v3221_v16 }
 0x377   : > { %5036 = vmatmul.mubr.msk.f32.gmra.mrb[148].mxu1 %vm438_vm1, %v3221_v16  ;;  %4224 = vmatprep.mubr.f32.mxu0 %v5519_v0 }
 0x378   : > { %4313 = vmatprep.mubr.f32.mxu1 %v5519_v0 }
 0x37a   : > { %5031 = vmatmul.mubr.msk.f32.gmra.mrb[150].mxu0 %vm438_vm1, %v3222_v18 }
 0x37b   : > { %5037 = vmatmul.mubr.msk.f32.gmra.mrb[150].mxu1 %vm438_vm1, %v3222_v18  ;;  %4384 = vmatprep.mubr.f32.mxu0 %v5519_v0 }
 0x37c   : > { %4473 = vmatprep.mubr.f32.mxu1 %v5519_v0 }
 0x37e   : > { %5040 = vmatmul.mubr.msk.f32.vlgmr.msra.gmra.mrb[152].mxu0 %vm438_vm1, %v6672_v9 }
 0x37f   : > { %5046 = vmatmul.mubr.msk.f32.vlgmr.msra.gmra.mrb[152].mxu1 %vm438_vm1, %v6672_v9  ;;  %4390 = vmatprep.mubr.f32.mxu0 %v5519_v0 }
 0x380   : > { %4479 = vmatprep.mubr.f32.mxu1 %v5519_v0  ;;  %5051 = vmatpush1.msk.msra.mxu0 %vm463_vm0, %v5453_v41 }
 0x381   : > { %5057 = vmatpush1.msk.msra.mxu1 %vm463_vm0, %v5454_v42 }
 0x382   : > { %5041 = vmatmul.mubr.msk.f32.gmra.mrb[154].mxu0 %vm438_vm1, %v6683_v10 }
 0x383   : > { %5047 = vmatmul.mubr.msk.f32.gmra.mrb[154].mxu1 %vm438_vm1, %v6683_v10  ;;  %4396 = vmatprep.mubr.f32.mxu0 %v5519_v0 }
 0x384   : > { %4485 = vmatprep.mubr.f32.mxu1 %v5519_v0 }
 0x386   : > { %5042 = vmatmul.mubr.msk.f32.gmra.mrb[156].mxu0 %vm438_vm1, %v3221_v16 }
 0x387   : > { %5048 = vmatmul.mubr.msk.f32.gmra.mrb[156].mxu1 %vm438_vm1, %v3221_v16  ;;  %4402 = vmatprep.mubr.f32.mxu0 %v5519_v0 }
 0x388   : > { %4491 = vmatprep.mubr.f32.mxu1 %v5519_v0 }
 0x38a   : > { %5043 = vmatmul.mubr.msk.f32.gmra.mrb[158].mxu0 %vm438_vm1, %v3222_v18 }
 0x38b   : > { %5049 = vmatmul.mubr.msk.f32.gmra.mrb[158].mxu1 %vm438_vm1, %v3222_v18  ;;  %4562 = vmatprep.mubr.f32.mxu0 %v5519_v0 }
 0x38c   : > { %4651 = vmatprep.mubr.f32.mxu1 %v5519_v0 }
 0x38e   : > { %5052 = vmatmul.mubr.msk.f32.vlgmr.msra.gmra.mrb[160].mxu0 %vm438_vm1, %v6672_v9 }
 0x38f   : > { %5058 = vmatmul.mubr.msk.f32.vlgmr.msra.gmra.mrb[160].mxu1 %vm438_vm1, %v6672_v9  ;;  %4568 = vmatprep.mubr.f32.mxu0 %v5519_v0 }
 0x390   : > { %4657 = vmatprep.mubr.f32.mxu1 %v5519_v0 }
 0x392   : > { %5053 = vmatmul.mubr.msk.f32.gmra.mrb[162].mxu0 %vm438_vm1, %v6683_v10 }
 0x393   : > { %5059 = vmatmul.mubr.msk.f32.gmra.mrb[162].mxu1 %vm438_vm1, %v6683_v10  ;;  %4574 = vmatprep.mubr.f32.mxu0 %v5519_v0 }
 0x394   : > { %4663 = vmatprep.mubr.f32.mxu1 %v5519_v0 }
 0x396   : > { %5054 = vmatmul.mubr.msk.f32.gmra.mrb[164].mxu0 %vm438_vm1, %v3221_v16 }
 0x397   : > { %5060 = vmatmul.mubr.msk.f32.gmra.mrb[164].mxu1 %vm438_vm1, %v3221_v16  ;;  %4580 = vmatprep.mubr.f32.mxu0 %v5519_v0 }
 0x398   : > { %4669 = vmatprep.mubr.f32.mxu1 %v5519_v0 }
 0x39a   : > { %5055 = vmatmul.mubr.msk.f32.gmra.mrb[166].mxu0 %vm438_vm1, %v3222_v18 }
 0x39b   : > { %5061 = vmatmul.mubr.msk.f32.gmra.mrb[166].mxu1 %vm438_vm1, %v3222_v18 }
 0x431   : > { %v4030_v4 = vpop.f32.mrb[136].mxu0 }
 0x432   : > { %4676 = vst [vmem:[%s6787_s16] sm:$0xff] %v4030_v4  ;;  %v4119_v0 = vpop.f32.mrb[136].mxu1  ;;  %v4032_v5 = vpop.f32.mrb[137].mxu0 }
 0x433   : > { %4678 = vst [vmem:[%s6787_s16 + $0x10] sm:$0xff] %v4119_v0  ;;  %4677 = vst [vmem:[%s6787_s16 + $0x8] sm:$0xff] %v4032_v5  ;;  %v4121_v6 = vpop.f32.mrb[137].mxu1 }
 0x434   : > { %4679 = vst [vmem:[%s6787_s16 + $0x18] sm:$0xff] %v4121_v6 }
 0x435   : > { %v4036_v35 = vpop.f32.mrb[138].mxu0 }
 0x436   : > { %4692 = vst [vmem:[%s6787_s16 + $0x80] sm:$0xff] %v4036_v35  ;;  %v4125_v8 = vpop.f32.mrb[138].mxu1  ;;  %v4038_v53 = vpop.f32.mrb[139].mxu0 }
 0x437   : > { %4694 = vst [vmem:[%s6787_s16 + $0x90] sm:$0xff] %v4125_v8  ;;  %4693 = vst [vmem:[%s6787_s16 + $0x88] sm:$0xff] %v4038_v53  ;;  %v4127_v48 = vpop.f32.mrb[139].mxu1 }
 0x438   : > { %4695 = vst [vmem:[%s6787_s16 + $0x98] sm:$0xff] %v4127_v48 }
 0x439   : > { %v4042_v52 = vpop.f32.mrb[140].mxu0 }
 0x43a   : > { %4708 = vst [vmem:[%s6787_s16 + $0x100] sm:$0xff] %v4042_v52  ;;  %v4131_v11 = vpop.f32.mrb[140].mxu1  ;;  %v4044_v12 = vpop.f32.mrb[141].mxu0 }
 0x43b   : > { %4710 = vst [vmem:[%s6787_s16 + $0x110] sm:$0xff] %v4131_v11  ;;  %4709 = vst [vmem:[%s6787_s16 + $0x108] sm:$0xff] %v4044_v12  ;;  %v4133_v15 = vpop.f32.mrb[141].mxu1 }
 0x43c   : > { %4711 = vst [vmem:[%s6787_s16 + $0x118] sm:$0xff] %v4133_v15 }
 0x43d   : > { %v4048_v22 = vpop.f32.mrb[142].mxu0 }
 0x43e   : > { %4724 = vst [vmem:[%s6787_s16 + $0x180] sm:$0x7f] %v4048_v22  ;;  %v4137_v23 = vpop.f32.mrb[142].mxu1  ;;  %v4050_v24 = vpop.f32.mrb[143].mxu0 }
 0x43f   : > { %4726 = vst [vmem:[%s6787_s16 + $0x190] sm:$0x7f] %v4137_v23  ;;  %4725 = vst [vmem:[%s6787_s16 + $0x188] sm:$0x7f] %v4050_v24  ;;  %v4139_v55 = vpop.f32.mrb[143].mxu1 }
 0x440   : > { %4727 = vst [vmem:[%s6787_s16 + $0x198] sm:$0x7f] %v4139_v55 }
 0x441   : > { %v4208_v25 = vpop.f32.mrb[144].mxu0 }
 0x442   : > { %4680 = vst [vmem:[%s6787_s16 + $0x20] sm:$0xff] %v4208_v25  ;;  %v4297_v26 = vpop.f32.mrb[144].mxu1  ;;  %v4210_v28 = vpop.f32.mrb[145].mxu0 }
 0x443   : > { %4682 = vst [vmem:[%s6787_s16 + $0x30] sm:$0xff] %v4297_v26  ;;  %4681 = vst [vmem:[%s6787_s16 + $0x28] sm:$0xff] %v4210_v28  ;;  %v4299_v40 = vpop.f32.mrb[145].mxu1 }
 0x444   : > { %4683 = vst [vmem:[%s6787_s16 + $0x38] sm:$0xff] %v4299_v40 }
 0x445   : > { %v4214_v29 = vpop.f32.mrb[146].mxu0 }
 0x446   : > { %4696 = vst [vmem:[%s6787_s16 + $0xa0] sm:$0xff] %v4214_v29  ;;  %v4303_v56 = vpop.f32.mrb[146].mxu1  ;;  %v4216_v32 = vpop.f32.mrb[147].mxu0 }
 0x447   : > { %4698 = vst [vmem:[%s6787_s16 + $0xb0] sm:$0xff] %v4303_v56  ;;  %4697 = vst [vmem:[%s6787_s16 + $0xa8] sm:$0xff] %v4216_v32  ;;  %v4305_v33 = vpop.f32.mrb[147].mxu1 }
 0x448   : > { %4699 = vst [vmem:[%s6787_s16 + $0xb8] sm:$0xff] %v4305_v33 }
 0x449   : > { %v4220_v31 = vpop.f32.mrb[148].mxu0 }
 0x44a   : > { %4712 = vst [vmem:[%s6787_s16 + $0x120] sm:$0xff] %v4220_v31  ;;  %v4309_v34 = vpop.f32.mrb[148].mxu1  ;;  %v4222_v49 = vpop.f32.mrb[149].mxu0 }
 0x44b   : > { %4714 = vst [vmem:[%s6787_s16 + $0x130] sm:$0xff] %v4309_v34  ;;  %4713 = vst [vmem:[%s6787_s16 + $0x128] sm:$0xff] %v4222_v49  ;;  %v4311_v37 = vpop.f32.mrb[149].mxu1 }
 0x44c   : > { %4715 = vst [vmem:[%s6787_s16 + $0x138] sm:$0xff] %v4311_v37 }
 0x44d   : > { %v4226_v38 = vpop.f32.mrb[150].mxu0 }
 0x44e   : > { %4728 = vst [vmem:[%s6787_s16 + $0x1a0] sm:$0x7f] %v4226_v38  ;;  %v4315_v36 = vpop.f32.mrb[150].mxu1  ;;  %v4228_v44 = vpop.f32.mrb[151].mxu0 }
 0x44f   : > { %4730 = vst [vmem:[%s6787_s16 + $0x1b0] sm:$0x7f] %v4315_v36  ;;  %4729 = vst [vmem:[%s6787_s16 + $0x1a8] sm:$0x7f] %v4228_v44  ;;  %v4317_v46 = vpop.f32.mrb[151].mxu1 }
 0x450   : > { %4731 = vst [vmem:[%s6787_s16 + $0x1b8] sm:$0x7f] %v4317_v46 }
 0x451   : > { %v4386_v47 = vpop.f32.mrb[152].mxu0 }
 0x452   : > { %4684 = vst [vmem:[%s6787_s16 + $0x40] sm:$0xff] %v4386_v47  ;;  %v4475_v50 = vpop.f32.mrb[152].mxu1  ;;  %v4388_v51 = vpop.f32.mrb[153].mxu0 }
 0x453   : > { %4686 = vst [vmem:[%s6787_s16 + $0x50] sm:$0xff] %v4475_v50  ;;  %4685 = vst [vmem:[%s6787_s16 + $0x48] sm:$0xff] %v4388_v51  ;;  %v4477_v45 = vpop.f32.mrb[153].mxu1 }
 0x454   : > { %4687 = vst [vmem:[%s6787_s16 + $0x58] sm:$0xff] %v4477_v45 }
 0x455   : > { %v4392_v27 = vpop.f32.mrb[154].mxu0 }
 0x456   : > { %4700 = vst [vmem:[%s6787_s16 + $0xc0] sm:$0xff] %v4392_v27  ;;  %v4481_v54 = vpop.f32.mrb[154].mxu1  ;;  %v4394_v62 = vpop.f32.mrb[155].mxu0 }
 0x457   : > { %4702 = vst [vmem:[%s6787_s16 + $0xd0] sm:$0xff] %v4481_v54  ;;  %4701 = vst [vmem:[%s6787_s16 + $0xc8] sm:$0xff] %v4394_v62  ;;  %v4483_v21 = vpop.f32.mrb[155].mxu1 }
 0x458   : > { %4703 = vst [vmem:[%s6787_s16 + $0xd8] sm:$0xff] %v4483_v21 }
 0x459   : > { %v4398_v57 = vpop.f32.mrb[156].mxu0 }
 0x45a   : > { %4716 = vst [vmem:[%s6787_s16 + $0x140] sm:$0xff] %v4398_v57  ;;  %v4487_v43 = vpop.f32.mrb[156].mxu1  ;;  %v4400_v58 = vpop.f32.mrb[157].mxu0 }
 0x45b   : > { %4718 = vst [vmem:[%s6787_s16 + $0x150] sm:$0xff] %v4487_v43  ;;  %4717 = vst [vmem:[%s6787_s16 + $0x148] sm:$0xff] %v4400_v58  ;;  %v4489_v60 = vpop.f32.mrb[157].mxu1 }
 0x45c   : > { %4719 = vst [vmem:[%s6787_s16 + $0x158] sm:$0xff] %v4489_v60 }
 0x45d   : > { %v4404_v61 = vpop.f32.mrb[158].mxu0 }
 0x45e   : > { %4732 = vst [vmem:[%s6787_s16 + $0x1c0] sm:$0x7f] %v4404_v61  ;;  %v4493_v63 = vpop.f32.mrb[158].mxu1  ;;  %v4406_v1 = vpop.f32.mrb[159].mxu0 }
 0x45f   : > { %4734 = vst [vmem:[%s6787_s16 + $0x1d0] sm:$0x7f] %v4493_v63  ;;  %4733 = vst [vmem:[%s6787_s16 + $0x1c8] sm:$0x7f] %v4406_v1  ;;  %v4495_v2 = vpop.f32.mrb[159].mxu1 }
 0x460   : > { %4735 = vst [vmem:[%s6787_s16 + $0x1d8] sm:$0x7f] %v4495_v2 }
 0x461   : > { %v4564_v7 = vpop.f32.mrb[160].mxu0 }
 0x462   : > { %4688 = vst [vmem:[%s6787_s16 + $0x60] sm:$0xff] %v4564_v7  ;;  %v4653_v30 = vpop.f32.mrb[160].mxu1  ;;  %v4566_v17 = vpop.f32.mrb[161].mxu0 }
 0x463   : > { %4690 = vst [vmem:[%s6787_s16 + $0x70] sm:$0xff] %v4653_v30  ;;  %4689 = vst [vmem:[%s6787_s16 + $0x68] sm:$0xff] %v4566_v17  ;;  %v4655_v39 = vpop.f32.mrb[161].mxu1 }
 0x464   : > { %4691 = vst [vmem:[%s6787_s16 + $0x78] sm:$0xff] %v4655_v39 }
 0x465   : > { %v4570_v59 = vpop.f32.mrb[162].mxu0 }
 0x466   : > { %4704 = vst [vmem:[%s6787_s16 + $0xe0] sm:$0xff] %v4570_v59  ;;  %v4659_v20 = vpop.f32.mrb[162].mxu1  ;;  %v4572_v9 = vpop.f32.mrb[163].mxu0 }
 0x467   : > { %4706 = vst [vmem:[%s6787_s16 + $0xf0] sm:$0xff] %v4659_v20  ;;  %4705 = vst [vmem:[%s6787_s16 + $0xe8] sm:$0xff] %v4572_v9  ;;  %v4661_v10 = vpop.f32.mrb[163].mxu1 }
 0x468   : > { %4707 = vst [vmem:[%s6787_s16 + $0xf8] sm:$0xff] %v4661_v10 }
 0x469   : > { %v4576_v13 = vpop.f32.mrb[164].mxu0 }
 0x46a   : > { %4720 = vst [vmem:[%s6787_s16 + $0x160] sm:$0xff] %v4576_v13  ;;  %v4665_v14 = vpop.f32.mrb[164].mxu1  ;;  %v4578_v16 = vpop.f32.mrb[165].mxu0  ;;  %4747 = sbr.rel (!%p5612_p5) target bundleno = 1166 (0x48e), region = 60 }
 0x46b   : > { %4722 = vst [vmem:[%s6787_s16 + $0x170] sm:$0xff] %v4665_v14  ;;  %4721 = vst [vmem:[%s6787_s16 + $0x168] sm:$0xff] %v4578_v16  ;;  %v4667_v18 = vpop.f32.mrb[165].mxu1 }
 0x46c   : > { %4723 = vst [vmem:[%s6787_s16 + $0x178] sm:$0xff] %v4667_v18 }
 0x46d   : > { %v4582_v19 = vpop.f32.mrb[166].mxu0 }
 0x46e   : > { %4736 = vst [vmem:[%s6787_s16 + $0x1e0] sm:$0x7f] %v4582_v19  ;;  %v4671_v3 = vpop.f32.mrb[166].mxu1  ;;  %v4584_v41 = vpop.f32.mrb[167].mxu0 }
 0x46f   : > { %4738 = vst [vmem:[%s6787_s16 + $0x1f0] sm:$0x7f] %v4671_v3  ;;  %4737 = vst [vmem:[%s6787_s16 + $0x1e8] sm:$0x7f] %v4584_v41  ;;  %v4673_v42 = vpop.f32.mrb[167].mxu1 }
 0x470   : > { %4739 = vst [vmem:[%s6787_s16 + $0x1f8] sm:$0x7f] %v4673_v42 }
 0x471   : > { %s6939_s24 = smov (!%p4750_p11, %s4749_s24), 16 }
 0x472   : > { %s6863_s22 = sshll.u32 %s6939_s24, 9 }
 0x473   : > { %s4754_s25 = ssub.s32 8192, %s6863_s22 }
 0x474   : > { %4755 = vsyncadd %s6855_s23, %s4754_s25  ;;  %p5065_p12 = scmp.ne.s32.totalorder %s6863_s22, 0  ;;  %s5072_s19 = sshll.u32 %s5595_s13, 11 }
 0x475   : > { %s6872_s21 = scalar_lea.hbm %s6931_s9, %s5072_s19  ;;  %s5067_s28 = sshll.u32 %s6939_s24, 3 }
 0x476   : > { %s4761_s29 = sshll.u32 %s6787_s16, 4  ;;  %s5521_s14 = smov [#allocation2]   ;;  %s6876_s29 = int_to_ptr.vmem [resolvable:$true] %s4761_s29 }
 0x477   : > { %s5455_s17 = scalar_lea.vmem %s6876_s29, %s6863_s22  ;;  %s5459_s25 = sshll.u32 %s5521_s14, 4  ;;  %s5460_s25 = int_to_ptr.vmem [resolvable:$false] %s5459_s25 }
 0x478   : > { %p5456_p13 = scmp.ne.s32.totalorder %s6876_s29, %s5455_s17  ;;  %s5461_s13 = scalar_lea.vmem %s5460_s25, 16384 }
 0x479   : > { %p5462_p2 = scmp.lt.s32.totalorder %s6876_s29, %s5460_s25  ;;  %p5463_p3 = scmp.lt.s32.totalorder %s5461_s13, %s5455_s17 }
 0x47a   : > { %p5457_p0 = pnand %p5456_p13, %p5065_p12 }
 0x47b   : > { %p5464_p4 = por %p5463_p3, %p5462_p2 }
 0x47c   : > { %p5458_p1 = pneg %p5457_p0 }
 0x47e   : > { %p5465_p5 = pnand %p5464_p4, %p5458_p1 }
 0x480   : > { %5468 = shalt.err (!%p5465_p5)
}
 0x481   : > { %s5469_s16 = scalar_lea.hbm %s6872_s21, %s6863_s22  ;;  %s5473_s27 = scalar_lea.hbm %s6931_s9, 20480 }
 0x482   : > { %p5470_p7 = scmp.ne.s32.totalorder %s6872_s21, %s5469_s16  ;;  %p5474_p10 = scmp.lt.u32.totalorder %s6872_s21, %s6931_s9 }
 0x483   : > { %p5475_p11 = scmp.lt.u32.totalorder %s5473_s27, %s5469_s16  ;;  %p5477_p0 = scmp.lt.u32.totalorder %s5469_s16, %s6872_s21 }
 0x484   : > { %p5471_p8 = pnand %p5470_p7, %p5065_p12 }
 0x485   : > { %p5476_p13 = por %p5475_p11, %p5474_p10 }
 0x486   : > { %p5472_p9 = pneg %p5471_p8 }
 0x487   : > { %p5478_p1 = por %p5477_p0, %p5476_p13 }
 0x489   : > { %p5479_p2 = pnand %p5478_p1, %p5472_p9 }
 0x48b   : > { %5482 = shalt.err (!%p5479_p2)
}
 0x48c   : > { %s5522_s25 = smov 2048   ;;  %s5523_s13 = smov 5120  }
 0x48d   : > { %4767 = dma.vmem_to_hbm [thread:$0]  (%p5065_p12), %s6876_s29, %s6863_s22, %s6872_s21, %s6855_s23, %s5522_s25, %s5523_s13, %s5067_s28  }
 0x48e PF: > { %p5400_p3 = scmp.ge.s32.totalorder %s5517_s12, 2  ;;  %s4776_s16 = sand.u32 1, %s5505_s30  }
 0x48f   : > { %s4777_s19 = scalar_lea.sflag [#allocation3], %s4776_s16 }
 0x490   : > { %p5397_p4 = pnand %p5400_p3, %p5616_p6 }
 0x492   : > { %5500 = dma.done.wait (!%p5397_p4), %s4777_s19, 8192  }
 0x493   : > { %5502 = vsyncadd (!%p5397_p4), %s4777_s19, 4294959104  ;;  %p19_p5 = scmp.ge.s32.totalorder %s5599_s15, 5   ;;  %s6934_s30 = smov %s5509_s10 }
 0x494   : > { %s6935_s10 = smov %s5513_s11  ;;  %s6936_s11 = smov %s5610_s18 }
 0x495   : > { %s6937_s12 = smov %s5599_s15  ;;  %21 = sbr.rel (!%p19_p5) target bundleno = 3 (0x3), region = 91 }
 0x49c   :  { %4782 = vsyncpa [#allocation3], 1 }
 0x49d   :  { %4784 = vsyncpa [#allocation3 + $0x1], 1 }

</bundles_post_ra>
